<compile_context>
chip_gen: v7x
topology: tpu7x:2x2x1
jax: 0.10.0
libtpu: 0.0.40
codegen_flags: <defaults>
</compile_context>

<pallas_src>
import functools
import math

import jax
import jax.numpy as jnp
from jax import lax
from jax.experimental import pallas as pl
from jax.experimental.pallas import tpu as pltpu


# ----------------------------------------------------------------------------
# Fused MHA kernel: one grid step == (one batch element, one q tile), all heads.
# ----------------------------------------------------------------------------
def _mha_fused_kernel(q_ref, k_ref, v_ref, m_ref,
                      wq_ref, bq_ref, wk_ref, bk_ref, wv_ref, bv_ref,
                      wfc_ref, bfc_ref, g_ref, beta_ref,
                      o_ref, a_ref, *, n_head, d_k, d_v):
    f32 = jnp.float32
    bf16 = jnp.bfloat16

    xq = q_ref[0]                              # (bq, d_model) f32 -- also residual
    xk = k_ref[0]                              # (Lk, d_model)
    xv = v_ref[0]                              # (Lk, d_model)
    bias = m_ref[0].astype(f32)                # (bq, Lk) additive {0, -inf} mask

    # --- fused Q/K/V projections: bf16 MXU operands, f32 accumulation --------
    q_proj = jnp.dot(xq.astype(bf16), wq_ref[...],
                     preferred_element_type=f32) + bq_ref[...]
    k_proj = jnp.dot(xk.astype(bf16), wk_ref[...],
                     preferred_element_type=f32) + bk_ref[...]
    v_proj = jnp.dot(xv.astype(bf16), wv_ref[...],
                     preferred_element_type=f32) + bv_ref[...]

    bq_len = q_proj.shape[0]
    lk = k_proj.shape[0]

    # Head-major (n_head, len, d): one relayout per tensor instead of n_head
    # narrow lane slices + concatenate.
    q3 = jnp.transpose(q_proj.reshape(bq_len, n_head, d_k), (1, 0, 2)).astype(bf16)
    k3 = jnp.transpose(k_proj.reshape(lk, n_head, d_k), (1, 0, 2)).astype(bf16)
    v3 = jnp.transpose(v_proj.reshape(lk, n_head, d_v), (1, 0, 2)).astype(bf16)

    # Scores (1/temperature already folded into w_qs/b_qs), masked via additive
    # bias; softmax in f32 with EUP approximate reciprocal.
    s = jnp.einsum("hqd,hkd->hqk", q3, k3, preferred_element_type=f32)
    s = s + bias                               # broadcast over heads
    s_max = jnp.max(s, axis=-1, keepdims=True)
    e = jnp.exp(s - s_max)
    denom = jnp.sum(e, axis=-1, keepdims=True)
    p = e * pl.reciprocal(denom, approx=True)  # (n_head, bq, Lk)

    a_ref[...] = jnp.expand_dims(p, 1).astype(a_ref.dtype)

    # Head-batched PV; re-concat heads with one transpose + reshape.
    o3 = jnp.einsum("hqk,hkd->hqd", p.astype(bf16), v3,
                    preferred_element_type=f32)                    # (n_head, bq, d_v)
    concat = jnp.transpose(o3, (1, 0, 2)).reshape(bq_len, n_head * d_v).astype(bf16)

    # --- fc + (dropout=identity) + residual + LayerNorm (two-pass variance) ---
    fc = jnp.dot(concat, wfc_ref[...], preferred_element_type=f32) + bfc_ref[...]
    y = fc + xq
    mean = jnp.mean(y, axis=-1, keepdims=True)
    yc = y - mean
    var = jnp.mean(yc * yc, axis=-1, keepdims=True)
    y_n = yc * lax.rsqrt(var + 1e-5)
    o_ref[0] = (y_n * g_ref[...] + beta_ref[...]).astype(o_ref.dtype)


def _vmem_limit_bytes(n_head, d_model, d_k, d_v, block_q, len_k, attn_itemsize):
    f32, bf16 = 4, 2
    dq, dvv = n_head * d_k, n_head * d_v
    weights = ((2 * d_model * dq + d_model * dvv + dvv * d_model) * bf16
               + (2 * dq + dvv + 3 * d_model) * f32)               # single-buffered
    tiles = 2 * ((2 * block_q * d_model + 2 * len_k * d_model) * f32
                 + block_q * len_k * bf16
                 + n_head * block_q * len_k * attn_itemsize)       # double-buffered
    interm = (4 * n_head * block_q * len_k
              + 8 * max(block_q, len_k) * max(dq, dvv, d_model)) * f32
    est = weights + tiles + interm
    return int(min(64 * 2 ** 20, max(16 * 2 ** 20, 2 * est)))


def multihead_attention(params, q, k, v, mask, *, n_head, d_k, d_v,
                        block_q=None, attn_dtype=jnp.float32):
    f32, bf16 = jnp.float32, jnp.bfloat16
    sz_b, len_q, d_model = q.shape
    len_k = k.shape[1]
    dq = n_head * d_k
    dv = n_head * d_v
    inv_temp = 1.0 / float(math.sqrt(d_k))

    if block_q is None:
        block_q = len_q if len_q <= 128 else 128
    assert len_q % block_q == 0, "pad len_q to a multiple of block_q"
    n_qt = len_q // block_q

    # One-time constant folds (outside the kernel; negligible cost):
    #   1/temperature into the Q projection, boolean mask -> bf16 additive bias,
    #   all matmul weights as bf16 MXU operands.
    w_qs = (params["w_qs"].astype(f32) * inv_temp).astype(bf16)
    b_qs = params["b_qs"].astype(f32) * inv_temp
    w_ks = params["w_ks"].astype(bf16)
    w_vs = params["w_vs"].astype(bf16)
    w_fc = params["w_fc"].astype(bf16)
    mask_bias = jnp.where(mask != 0, -jnp.inf, 0.0).astype(bf16)

    kernel = functools.partial(_mha_fused_kernel, n_head=n_head, d_k=d_k, d_v=d_v)

    def const_spec(shape):
        # constant across the whole grid -> single-buffered (no 2x VMEM waste)
        return pl.BlockSpec(shape, lambda b, t: (0,) * len(shape),
                            pipeline_mode=pl.Buffered(1))

    vmem_limit = _vmem_limit_bytes(n_head, d_model, d_k, d_v, block_q, len_k,
                                   jnp.dtype(attn_dtype).itemsize)

    out, attn4 = pl.pallas_call(
        kernel,
        grid=(sz_b, n_qt),
        in_specs=[
            pl.BlockSpec((1, block_q, d_model), lambda b, t: (b, t, 0)),   # q tile
            pl.BlockSpec((1, len_k, d_model), lambda b, t: (b, 0, 0)),     # k
            pl.BlockSpec((1, len_k, d_model), lambda b, t: (b, 0, 0)),     # v
            pl.BlockSpec((1, block_q, len_k), lambda b, t: (b, t, 0)),     # mask bias
            const_spec((d_model, dq)), const_spec((1, dq)),                # w_qs, b_qs
            const_spec((d_model, dq)), const_spec((1, dq)),                # w_ks, b_ks
            const_spec((d_model, dv)), const_spec((1, dv)),                # w_vs, b_vs
            const_spec((dv, d_model)), const_spec((1, d_model)),           # w_fc, b_fc
            const_spec((1, d_model)), const_spec((1, d_model)),            # ln_g, ln_b
        ],
        out_specs=[
            pl.BlockSpec((1, block_q, d_model), lambda b, t: (b, t, 0)),
            pl.BlockSpec((n_head, 1, block_q, len_k), lambda b, t: (0, b, t, 0)),
        ],
        out_shape=[
            jax.ShapeDtypeStruct((sz_b, len_q, d_model), jnp.float32),
            jax.ShapeDtypeStruct((n_head, sz_b, len_q, len_k), attn_dtype),
        ],
        compiler_params=pltpu.CompilerParams(
            dimension_semantics=("parallel", "parallel"),
            vmem_limit_bytes=vmem_limit),
    )(q, k, v, mask_bias,
      w_qs, b_qs.reshape(1, dq),
      w_ks, params["b_ks"].astype(f32).reshape(1, dq),
      w_vs, params["b_vs"].astype(f32).reshape(1, dv),
      w_fc, params["b_fc"].astype(f32).reshape(1, d_model),
      params["ln_g"].astype(f32).reshape(1, d_model),
      params["ln_b"].astype(f32).reshape(1, d_model))

    # head-major flatten: (n_head, sz_b, Lq, Lk) -> (n_head*sz_b, Lq, Lk) is free.
    attn = attn4.reshape(n_head * sz_b, len_q, len_k)
    return out, attn


# ----------------------------------------------------------------------------
# Pure-JAX reference (mirrors the PyTorch forward, f32 math) for a sanity check.
# ----------------------------------------------------------------------------
def reference_mha(params, q, k, v, mask, *, n_head, d_k, d_v):
    f32 = jnp.float32
    w_qs = params["w_qs"].astype(f32); w_ks = params["w_ks"].astype(f32)
    w_vs = params["w_vs"].astype(f32); w_fc = params["w_fc"].astype(f32)
    sz_b, len_q, d_model = q.shape
    len_k = k.shape[1]
    qp = (q.reshape(-1, d_model) @ w_qs + params["b_qs"]).reshape(sz_b, len_q, n_head, d_k)
    kp = (k.reshape(-1, d_model) @ w_ks + params["b_ks"]).reshape(sz_b, len_k, n_head, d_k)
    vp = (v.reshape(-1, d_model) @ w_vs + params["b_vs"]).reshape(sz_b, len_k, n_head, d_v)
    q3 = qp.transpose(2, 0, 1, 3).reshape(-1, len_q, d_k)
    k3 = kp.transpose(2, 0, 1, 3).reshape(-1, len_k, d_k)
    v3 = vp.transpose(2, 0, 1, 3).reshape(-1, len_k, d_v)
    m3 = jnp.tile(mask, (n_head, 1, 1))
    s = jnp.einsum("bqd,bkd->bqk", q3, k3) / math.sqrt(d_k)
    s = jnp.where(m3 != 0, -jnp.inf, s)
    p = jax.nn.softmax(s, axis=-1)
    o = jnp.einsum("bqk,bkd->bqd", p, v3)
    o = (o.reshape(n_head, sz_b, len_q, d_v).transpose(1, 2, 0, 3)
          .reshape(sz_b, len_q, n_head * d_v))
    y = o @ w_fc + params["b_fc"] + q
    mean = y.mean(-1, keepdims=True)
    var = ((y - mean) ** 2).mean(-1, keepdims=True)
    out = (y - mean) / jnp.sqrt(var + 1e-5) * params["ln_g"] + params["ln_b"]
    return out, p


# ----------------------------------------------------------------------------
# Deterministic parameter construction (mirrors the PyTorch __init__ shapes).
# Matmul weights are stored bf16 (MXU operand dtype); biases / LN stay f32.
# ----------------------------------------------------------------------------
def init_params(key, n_head, d_model, d_k, d_v):
    ks = jax.random.split(key, 4)
    std_qk = math.sqrt(2.0 / (d_model + d_k))
    std_v = math.sqrt(2.0 / (d_model + d_v))
    std_fc = math.sqrt(2.0 / (n_head * d_v + d_model))  # xavier_normal

    # weights stored already transposed: (d_in, d_out), so y = x @ W + b
    return {
        "w_qs": (std_qk * jax.random.normal(ks[0], (d_model, n_head * d_k), jnp.float32)).astype(jnp.bfloat16),
        "b_qs": jnp.zeros((n_head * d_k,), jnp.float32),
        "w_ks": (std_qk * jax.random.normal(ks[1], (d_model, n_head * d_k), jnp.float32)).astype(jnp.bfloat16),
        "b_ks": jnp.zeros((n_head * d_k,), jnp.float32),
        "w_vs": (std_v * jax.random.normal(ks[2], (d_model, n_head * d_v), jnp.float32)).astype(jnp.bfloat16),
        "b_vs": jnp.zeros((n_head * d_v,), jnp.float32),
        "w_fc": (std_fc * jax.random.normal(ks[3], (n_head * d_v, d_model), jnp.float32)).astype(jnp.bfloat16),
        "b_fc": jnp.zeros((d_model,), jnp.float32),
        "ln_g": jnp.ones((d_model,), jnp.float32),
        "ln_b": jnp.zeros((d_model,), jnp.float32),
    }


if __name__ == "__main__":
    n_head, d_model, d_k, d_v = 4, 32, 8, 8
    sz_b, seq = 2, 8

    root = jax.random.PRNGKey(0)
    kp, kq, kk, kv, km = jax.random.split(root, 5)

    params = init_params(kp, n_head, d_model, d_k, d_v)

    q = jax.random.normal(kq, (sz_b, seq, d_model), jnp.float32)
    k = jax.random.normal(kk, (sz_b, seq, d_model), jnp.float32)
    v = jax.random.normal(kv, (sz_b, seq, d_model), jnp.float32)

    # boolean mask (nonzero == masked); keep the diagonal unmasked so no row
    # is fully masked (a fully-masked row is NaN in torch too).
    mask = (jax.random.uniform(km, (sz_b, seq, seq)) > 0.7).astype(jnp.int32)
    diag = jnp.arange(seq)
    mask = mask.at[:, diag, diag].set(0)

    fwd = jax.jit(
        functools.partial(multihead_attention, n_head=n_head, d_k=d_k, d_v=d_v)
    )
    output, attn = fwd(params, q, k, v, mask)
    jax.block_until_ready((output, attn))

    assert output.shape == (sz_b, seq, d_model)
    assert attn.shape == (n_head * sz_b, seq, seq)

    # Loose numerical sanity check vs. pure-JAX f32 reference (bf16 MXU operands
    # and EUP approx reciprocal introduce ~1e-2 relative differences).
    ref_out, ref_attn = reference_mha(params, q, k, v, mask,
                                      n_head=n_head, d_k=d_k, d_v=d_v)
    assert bool(jnp.all(jnp.isfinite(output))) and bool(jnp.all(jnp.isfinite(attn)))
    assert bool(jnp.allclose(output, ref_out, atol=5e-2, rtol=5e-2))
    assert bool(jnp.allclose(attn, ref_attn, atol=5e-2, rtol=5e-2))

    print("KERNEL_OK")
</pallas_src>

<mosaic_0001>
module attributes {stable_mosaic.version = 11 : i64} {
  func.func @_mha_fused_kernel(%arg0: i32, %arg1: i32, %arg2: memref<1x8x32xf32, #tpu.memory_space<vmem>>, %arg3: memref<1x8x32xf32, #tpu.memory_space<vmem>>, %arg4: memref<1x8x32xf32, #tpu.memory_space<vmem>>, %arg5: memref<1x8x8xbf16, #tpu.memory_space<vmem>>, %arg6: memref<32x32xbf16, #tpu.memory_space<vmem>>, %arg7: memref<1x32xf32, #tpu.memory_space<vmem>>, %arg8: memref<32x32xbf16, #tpu.memory_space<vmem>>, %arg9: memref<1x32xf32, #tpu.memory_space<vmem>>, %arg10: memref<32x32xbf16, #tpu.memory_space<vmem>>, %arg11: memref<1x32xf32, #tpu.memory_space<vmem>>, %arg12: memref<32x32xbf16, #tpu.memory_space<vmem>>, %arg13: memref<1x32xf32, #tpu.memory_space<vmem>>, %arg14: memref<1x32xf32, #tpu.memory_space<vmem>>, %arg15: memref<1x32xf32, #tpu.memory_space<vmem>>, %arg16: memref<1x8x32xf32, #tpu.memory_space<vmem>>, %arg17: memref<4x1x8x8xf32, #tpu.memory_space<vmem>>) attributes {dimension_semantics = [#tpu.dimension_semantics<parallel>, #tpu.dimension_semantics<parallel>], iteration_bounds = array<i64: 2, 1>, scalar_prefetch = 0 : i64, scratch_operands = 0 : i64, tpu.core_type = #tpu.core_type<tc>, window_params = [{transform_indices = @transform_0, window_bounds = array<i64: 1, 8, 32>}, {transform_indices = @transform_1, window_bounds = array<i64: 1, 8, 32>}, {transform_indices = @transform_2, window_bounds = array<i64: 1, 8, 32>}, {transform_indices = @transform_3, window_bounds = array<i64: 1, 8, 8>}, {pipeline_mode = #tpu.pipeline_mode<synchronous>, transform_indices = @transform_4, window_bounds = array<i64: 32, 32>}, {pipeline_mode = #tpu.pipeline_mode<synchronous>, transform_indices = @transform_5, window_bounds = array<i64: 1, 32>}, {pipeline_mode = #tpu.pipeline_mode<synchronous>, transform_indices = @transform_6, window_bounds = array<i64: 32, 32>}, {pipeline_mode = #tpu.pipeline_mode<synchronous>, transform_indices = @transform_7, window_bounds = array<i64: 1, 32>}, {pipeline_mode = #tpu.pipeline_mode<synchronous>, transform_indices = @transform_8, window_bounds = array<i64: 32, 32>}, {pipeline_mode = #tpu.pipeline_mode<synchronous>, transform_indices = @transform_9, window_bounds = array<i64: 1, 32>}, {pipeline_mode = #tpu.pipeline_mode<synchronous>, transform_indices = @transform_10, window_bounds = array<i64: 32, 32>}, {pipeline_mode = #tpu.pipeline_mode<synchronous>, transform_indices = @transform_11, window_bounds = array<i64: 1, 32>}, {pipeline_mode = #tpu.pipeline_mode<synchronous>, transform_indices = @transform_12, window_bounds = array<i64: 1, 32>}, {pipeline_mode = #tpu.pipeline_mode<synchronous>, transform_indices = @transform_13, window_bounds = array<i64: 1, 32>}, {transform_indices = @transform_14, window_bounds = array<i64: 1, 8, 32>}, {transform_indices = @transform_15, window_bounds = array<i64: 4, 1, 8, 8>}]} {
    %c0 = arith.constant 0 : index
    %c0_0 = arith.constant 0 : index
    %c0_1 = arith.constant 0 : index
    %0 = vector.load %arg2[%c0, %c0_0, %c0_1] : memref<1x8x32xf32, #tpu.memory_space<vmem>>, vector<1x8x32xf32>
    %1 = vector.shape_cast %0 : vector<1x8x32xf32> to vector<8x32xf32>
    %c0_2 = arith.constant 0 : index
    %c0_3 = arith.constant 0 : index
    %c0_4 = arith.constant 0 : index
    %2 = vector.load %arg3[%c0_2, %c0_3, %c0_4] : memref<1x8x32xf32, #tpu.memory_space<vmem>>, vector<1x8x32xf32>
    %3 = vector.shape_cast %2 : vector<1x8x32xf32> to vector<8x32xf32>
    %c0_5 = arith.constant 0 : index
    %c0_6 = arith.constant 0 : index
    %c0_7 = arith.constant 0 : index
    %4 = vector.load %arg4[%c0_5, %c0_6, %c0_7] : memref<1x8x32xf32, #tpu.memory_space<vmem>>, vector<1x8x32xf32>
    %5 = vector.shape_cast %4 : vector<1x8x32xf32> to vector<8x32xf32>
    %c0_8 = arith.constant 0 : index
    %c0_9 = arith.constant 0 : index
    %c0_10 = arith.constant 0 : index
    %6 = vector.load %arg5[%c0_8, %c0_9, %c0_10] : memref<1x8x8xbf16, #tpu.memory_space<vmem>>, vector<1x8x8xbf16>
    %7 = vector.shape_cast %6 : vector<1x8x8xbf16> to vector<8x8xbf16>
    %8 = arith.extf %7 : vector<8x8xbf16> to vector<8x8xf32>
    %9 = arith.truncf %1 : vector<8x32xf32> to vector<8x32xbf16>
    %c0_11 = arith.constant 0 : index
    %c0_12 = arith.constant 0 : index
    %10 = vector.load %arg6[%c0_11, %c0_12] : memref<32x32xbf16, #tpu.memory_space<vmem>>, vector<32x32xbf16>
    %cst = arith.constant dense<0.000000e+00> : vector<8x32xf32>
    %11 = tpu.matmul %9, %10, %cst {dimension_numbers = #tpu.dot_dimension_numbers<[1], [0], [0], [1], [0, 0, 1, 1], [], []>} : vector<8x32xbf16>, vector<32x32xbf16>, vector<8x32xf32> -> vector<8x32xf32>
    %c0_13 = arith.constant 0 : index
    %c0_14 = arith.constant 0 : index
    %12 = vector.load %arg7[%c0_13, %c0_14] : memref<1x32xf32, #tpu.memory_space<vmem>>, vector<1x32xf32>
    %13 = vector.broadcast %12 : vector<1x32xf32> to vector<8x32xf32>
    %14 = arith.addf %11, %13 : vector<8x32xf32>
    %15 = arith.truncf %3 : vector<8x32xf32> to vector<8x32xbf16>
    %c0_15 = arith.constant 0 : index
    %c0_16 = arith.constant 0 : index
    %16 = vector.load %arg8[%c0_15, %c0_16] : memref<32x32xbf16, #tpu.memory_space<vmem>>, vector<32x32xbf16>
    %cst_17 = arith.constant dense<0.000000e+00> : vector<8x32xf32>
    %17 = tpu.matmul %15, %16, %cst_17 {dimension_numbers = #tpu.dot_dimension_numbers<[1], [0], [0], [1], [0, 0, 1, 1], [], []>} : vector<8x32xbf16>, vector<32x32xbf16>, vector<8x32xf32> -> vector<8x32xf32>
    %c0_18 = arith.constant 0 : index
    %c0_19 = arith.constant 0 : index
    %18 = vector.load %arg9[%c0_18, %c0_19] : memref<1x32xf32, #tpu.memory_space<vmem>>, vector<1x32xf32>
    %19 = vector.broadcast %18 : vector<1x32xf32> to vector<8x32xf32>
    %20 = arith.addf %17, %19 : vector<8x32xf32>
    %21 = arith.truncf %5 : vector<8x32xf32> to vector<8x32xbf16>
    %c0_20 = arith.constant 0 : index
    %c0_21 = arith.constant 0 : index
    %22 = vector.load %arg10[%c0_20, %c0_21] : memref<32x32xbf16, #tpu.memory_space<vmem>>, vector<32x32xbf16>
    %cst_22 = arith.constant dense<0.000000e+00> : vector<8x32xf32>
    %23 = tpu.matmul %21, %22, %cst_22 {dimension_numbers = #tpu.dot_dimension_numbers<[1], [0], [0], [1], [0, 0, 1, 1], [], []>} : vector<8x32xbf16>, vector<32x32xbf16>, vector<8x32xf32> -> vector<8x32xf32>
    %c0_23 = arith.constant 0 : index
    %c0_24 = arith.constant 0 : index
    %24 = vector.load %arg11[%c0_23, %c0_24] : memref<1x32xf32, #tpu.memory_space<vmem>>, vector<1x32xf32>
    %25 = vector.broadcast %24 : vector<1x32xf32> to vector<8x32xf32>
    %26 = arith.addf %23, %25 : vector<8x32xf32>
    %27 = vector.shape_cast %14 : vector<8x32xf32> to vector<8x4x8xf32>
    %28 = tpu.transpose %27, [1, 0, 2] : vector<8x4x8xf32> -> vector<4x8x8xf32>
    %29 = arith.truncf %28 : vector<4x8x8xf32> to vector<4x8x8xbf16>
    %30 = vector.shape_cast %20 : vector<8x32xf32> to vector<8x4x8xf32>
    %31 = tpu.transpose %30, [1, 0, 2] : vector<8x4x8xf32> -> vector<4x8x8xf32>
    %32 = arith.truncf %31 : vector<4x8x8xf32> to vector<4x8x8xbf16>
    %33 = vector.shape_cast %26 : vector<8x32xf32> to vector<8x4x8xf32>
    %34 = tpu.transpose %33, [1, 0, 2] : vector<8x4x8xf32> -> vector<4x8x8xf32>
    %35 = arith.truncf %34 : vector<4x8x8xf32> to vector<4x8x8xbf16>
    "tpu.trace_start"() <{level = 10 : i32, message = "hqd,hkd->hqk"}> : () -> ()
    %cst_25 = arith.constant dense<0.000000e+00> : vector<4x8x8xf32>
    %36 = tpu.matmul %29, %32, %cst_25 {dimension_numbers = #tpu.dot_dimension_numbers<[2], [2], [1], [1], [0, 0, 0, 1, 1, 1], [0], [0]>} : vector<4x8x8xbf16>, vector<4x8x8xbf16>, vector<4x8x8xf32> -> vector<4x8x8xf32>
    "tpu.trace_stop"() : () -> ()
    %37 = vector.shape_cast %8 : vector<8x8xf32> to vector<1x8x8xf32>
    %38 = vector.broadcast %37 : vector<1x8x8xf32> to vector<4x8x8xf32>
    %39 = arith.addf %36, %38 : vector<4x8x8xf32>
    %cst_26 = arith.constant dense<0xFF800000> : vector<4x8xf32>
    %40 = vector.multi_reduction <maximumf>, %39, %cst_26 [2] : vector<4x8x8xf32> to vector<4x8xf32>
    %41 = vector.shape_cast %40 : vector<4x8xf32> to vector<4x8x1xf32>
    %42 = vector.broadcast %41 : vector<4x8x1xf32> to vector<4x8x8xf32>
    %43 = arith.subf %39, %42 : vector<4x8x8xf32>
    %44 = math.exp %43 : vector<4x8x8xf32>
    %cst_27 = arith.constant dense<0.000000e+00> : vector<4x8xf32>
    %45 = vector.multi_reduction <add>, %44, %cst_27 [2] : vector<4x8x8xf32> to vector<4x8xf32>
    %46 = vector.shape_cast %45 : vector<4x8xf32> to vector<4x8x1xf32>
    %47 = tpu.reciprocal %46 {approx = true} : vector<4x8x1xf32> -> vector<4x8x1xf32>
    %48 = vector.broadcast %47 : vector<4x8x1xf32> to vector<4x8x8xf32>
    %49 = arith.mulf %44, %48 : vector<4x8x8xf32>
    %50 = vector.shape_cast %49 : vector<4x8x8xf32> to vector<4x1x8x8xf32>
    %c0_28 = arith.constant 0 : index
    %c0_29 = arith.constant 0 : index
    %c0_30 = arith.constant 0 : index
    %c0_31 = arith.constant 0 : index
    %51 = vector.load %arg17[%c0_28, %c0_29, %c0_30, %c0_31] : memref<4x1x8x8xf32, #tpu.memory_space<vmem>>, vector<4x1x8x8xf32>
    tpu.vector_store %arg17[%c0_28, %c0_29, %c0_30, %c0_31], %50 {strides = array<i32>} : memref<4x1x8x8xf32, #tpu.memory_space<vmem>>, vector<4x1x8x8xf32>,
    %52 = arith.truncf %49 : vector<4x8x8xf32> to vector<4x8x8xbf16>
    "tpu.trace_start"() <{level = 10 : i32, message = "hqk,hkd->hqd"}> : () -> ()
    %cst_32 = arith.constant dense<0.000000e+00> : vector<4x8x8xf32>
    %53 = tpu.matmul %52, %35, %cst_32 {dimension_numbers = #tpu.dot_dimension_numbers<[2], [1], [1], [2], [0, 0, 0, 1, 1, 2], [0], [0]>} : vector<4x8x8xbf16>, vector<4x8x8xbf16>, vector<4x8x8xf32> -> vector<4x8x8xf32>
    "tpu.trace_stop"() : () -> ()
    %54 = tpu.transpose %53, [1, 0, 2] : vector<4x8x8xf32> -> vector<8x4x8xf32>
    %55 = vector.shape_cast %54 : vector<8x4x8xf32> to vector<8x32xf32>
    %56 = arith.truncf %55 : vector<8x32xf32> to vector<8x32xbf16>
    %c0_33 = arith.constant 0 : index
    %c0_34 = arith.constant 0 : index
    %57 = vector.load %arg12[%c0_33, %c0_34] : memref<32x32xbf16, #tpu.memory_space<vmem>>, vector<32x32xbf16>
    %cst_35 = arith.constant dense<0.000000e+00> : vector<8x32xf32>
    %58 = tpu.matmul %56, %57, %cst_35 {dimension_numbers = #tpu.dot_dimension_numbers<[1], [0], [0], [1], [0, 0, 1, 1], [], []>} : vector<8x32xbf16>, vector<32x32xbf16>, vector<8x32xf32> -> vector<8x32xf32>
    %c0_36 = arith.constant 0 : index
    %c0_37 = arith.constant 0 : index
    %59 = vector.load %arg13[%c0_36, %c0_37] : memref<1x32xf32, #tpu.memory_space<vmem>>, vector<1x32xf32>
    %60 = vector.broadcast %59 : vector<1x32xf32> to vector<8x32xf32>
    %61 = arith.addf %58, %60 : vector<8x32xf32>
    %62 = arith.addf %61, %1 : vector<8x32xf32>
    %cst_38 = arith.constant dense<0.000000e+00> : vector<8xf32>
    %63 = vector.multi_reduction <add>, %62, %cst_38 [1] : vector<8x32xf32> to vector<8xf32>
    %64 = vector.shape_cast %63 : vector<8xf32> to vector<8x1xf32>
    %cst_39 = arith.constant 3.200000e+01 : f32
    %65 = vector.broadcast %cst_39 : f32 to vector<8x1xf32>
    %66 = arith.divf %64, %65 : vector<8x1xf32>
    %67 = vector.broadcast %66 : vector<8x1xf32> to vector<8x32xf32>
    %68 = arith.subf %62, %67 : vector<8x32xf32>
    %69 = arith.mulf %68, %68 : vector<8x32xf32>
    %cst_40 = arith.constant dense<0.000000e+00> : vector<8xf32>
    %70 = vector.multi_reduction <add>, %69, %cst_40 [1] : vector<8x32xf32> to vector<8xf32>
    %71 = vector.shape_cast %70 : vector<8xf32> to vector<8x1xf32>
    %cst_41 = arith.constant 3.200000e+01 : f32
    %72 = vector.broadcast %cst_41 : f32 to vector<8x1xf32>
    %73 = arith.divf %71, %72 : vector<8x1xf32>
    %cst_42 = arith.constant 9.99999974E-6 : f32
    %74 = vector.broadcast %cst_42 : f32 to vector<8x1xf32>
    %75 = arith.addf %73, %74 : vector<8x1xf32>
    %76 = math.rsqrt %75 : vector<8x1xf32>
    %77 = vector.broadcast %76 : vector<8x1xf32> to vector<8x32xf32>
    %78 = arith.mulf %68, %77 : vector<8x32xf32>
    %c0_43 = arith.constant 0 : index
    %c0_44 = arith.constant 0 : index
    %79 = vector.load %arg14[%c0_43, %c0_44] : memref<1x32xf32, #tpu.memory_space<vmem>>, vector<1x32xf32>
    %80 = vector.broadcast %79 : vector<1x32xf32> to vector<8x32xf32>
    %81 = arith.mulf %78, %80 : vector<8x32xf32>
    %c0_45 = arith.constant 0 : index
    %c0_46 = arith.constant 0 : index
    %82 = vector.load %arg15[%c0_45, %c0_46] : memref<1x32xf32, #tpu.memory_space<vmem>>, vector<1x32xf32>
    %83 = vector.broadcast %82 : vector<1x32xf32> to vector<8x32xf32>
    %84 = arith.addf %81, %83 : vector<8x32xf32>
    %c0_47 = arith.constant 0 : index
    %c0_48 = arith.constant 0 : index
    %c0_49 = arith.constant 0 : index
    %85 = vector.load %arg16[%c0_47, %c0_48, %c0_49] : memref<1x8x32xf32, #tpu.memory_space<vmem>>, vector<1x8x32xf32>
    %86 = vector.shape_cast %85 : vector<1x8x32xf32> to vector<8x32xf32>
    %87 = vector.shape_cast %84 : vector<8x32xf32> to vector<1x8x32xf32>
    tpu.vector_store %arg16[%c0_47, %c0_48, %c0_49], %87 {strides = array<i32>} : memref<1x8x32xf32, #tpu.memory_space<vmem>>, vector<1x8x32xf32>,
    return
  }
  func.func @transform_0(%arg0: i32, %arg1: i32) -> (i32, i32, i32) {
    %c0_i32 = arith.constant 0 : i32
    %c0_i32_0 = arith.constant 0 : i32
    return %arg0, %arg1, %c0_i32 : i32, i32, i32
  }
  func.func @transform_1(%arg0: i32, %arg1: i32) -> (i32, i32, i32) {
    %c0_i32 = arith.constant 0 : i32
    %c0_i32_0 = arith.constant 0 : i32
    %c0_i32_1 = arith.constant 0 : i32
    return %arg0, %c0_i32, %c0_i32_0 : i32, i32, i32
  }
  func.func @transform_2(%arg0: i32, %arg1: i32) -> (i32, i32, i32) {
    %c0_i32 = arith.constant 0 : i32
    %c0_i32_0 = arith.constant 0 : i32
    %c0_i32_1 = arith.constant 0 : i32
    return %arg0, %c0_i32, %c0_i32_0 : i32, i32, i32
  }
  func.func @transform_3(%arg0: i32, %arg1: i32) -> (i32, i32, i32) {
    %c0_i32 = arith.constant 0 : i32
    %c0_i32_0 = arith.constant 0 : i32
    return %arg0, %arg1, %c0_i32 : i32, i32, i32
  }
  func.func @transform_4(%arg0: i32, %arg1: i32) -> (i32, i32) {
    %c0_i32 = arith.constant 0 : i32
    %c0_i32_0 = arith.constant 0 : i32
    %c0_i32_1 = arith.constant 0 : i32
    return %c0_i32, %c0_i32_0 : i32, i32
  }
  func.func @transform_5(%arg0: i32, %arg1: i32) -> (i32, i32) {
    %c0_i32 = arith.constant 0 : i32
    %c0_i32_0 = arith.constant 0 : i32
    %c0_i32_1 = arith.constant 0 : i32
    return %c0_i32, %c0_i32_0 : i32, i32
  }
  func.func @transform_6(%arg0: i32, %arg1: i32) -> (i32, i32) {
    %c0_i32 = arith.constant 0 : i32
    %c0_i32_0 = arith.constant 0 : i32
    %c0_i32_1 = arith.constant 0 : i32
    return %c0_i32, %c0_i32_0 : i32, i32
  }
  func.func @transform_7(%arg0: i32, %arg1: i32) -> (i32, i32) {
    %c0_i32 = arith.constant 0 : i32
    %c0_i32_0 = arith.constant 0 : i32
    %c0_i32_1 = arith.constant 0 : i32
    return %c0_i32, %c0_i32_0 : i32, i32
  }
  func.func @transform_8(%arg0: i32, %arg1: i32) -> (i32, i32) {
    %c0_i32 = arith.constant 0 : i32
    %c0_i32_0 = arith.constant 0 : i32
    %c0_i32_1 = arith.constant 0 : i32
    return %c0_i32, %c0_i32_0 : i32, i32
  }
  func.func @transform_9(%arg0: i32, %arg1: i32) -> (i32, i32) {
    %c0_i32 = arith.constant 0 : i32
    %c0_i32_0 = arith.constant 0 : i32
    %c0_i32_1 = arith.constant 0 : i32
    return %c0_i32, %c0_i32_0 : i32, i32
  }
  func.func @transform_10(%arg0: i32, %arg1: i32) -> (i32, i32) {
    %c0_i32 = arith.constant 0 : i32
    %c0_i32_0 = arith.constant 0 : i32
    %c0_i32_1 = arith.constant 0 : i32
    return %c0_i32, %c0_i32_0 : i32, i32
  }
  func.func @transform_11(%arg0: i32, %arg1: i32) -> (i32, i32) {
    %c0_i32 = arith.constant 0 : i32
    %c0_i32_0 = arith.constant 0 : i32
    %c0_i32_1 = arith.constant 0 : i32
    return %c0_i32, %c0_i32_0 : i32, i32
  }
  func.func @transform_12(%arg0: i32, %arg1: i32) -> (i32, i32) {
    %c0_i32 = arith.constant 0 : i32
    %c0_i32_0 = arith.constant 0 : i32
    %c0_i32_1 = arith.constant 0 : i32
    return %c0_i32, %c0_i32_0 : i32, i32
  }
  func.func @transform_13(%arg0: i32, %arg1: i32) -> (i32, i32) {
    %c0_i32 = arith.constant 0 : i32
    %c0_i32_0 = arith.constant 0 : i32
    %c0_i32_1 = arith.constant 0 : i32
    return %c0_i32, %c0_i32_0 : i32, i32
  }
  func.func @transform_14(%arg0: i32, %arg1: i32) -> (i32, i32, i32) {
    %c0_i32 = arith.constant 0 : i32
    %c0_i32_0 = arith.constant 0 : i32
    return %arg0, %arg1, %c0_i32 : i32, i32, i32
  }
  func.func @transform_15(%arg0: i32, %arg1: i32) -> (i32, i32, i32, i32) {
    %c0_i32 = arith.constant 0 : i32
    %c0_i32_0 = arith.constant 0 : i32
    %c0_i32_1 = arith.constant 0 : i32
    return %c0_i32, %arg0, %arg1, %c0_i32_0 : i32, i32, i32, i32
  }
}

</mosaic_0001>

<bundles_post_ra>
// kernel: multihead_attention.1
= control target key start
LH: loop header
LB: loop body
LE: loop exit
PB: predicated region body
PF: predicated region fallthrough
CT: control target
= control target key end

     0   :  { %s3491_s0 = inlined_call_operand.vmem [shape: f32[2,8,32], index: 0, kind: input, shape index: {}]   ;;  %s3492_s1 = inlined_call_operand.vmem [shape: f32[2,8,32], index: 1, kind: input, shape index: {}]   ;;  %s3493_s2 = inlined_call_operand.vmem [shape: f32[2,8,32], index: 2, kind: input, shape index: {}]   ;;  %s3494_s3 = inlined_call_operand.vmem [shape: bf16[2,8,8], index: 3, kind: input, shape index: {}]   ;;  %s3495_s4 = inlined_call_operand.vmem [shape: bf16[32,32], index: 4, kind: input, shape index: {}]   ;;  %s3496_s5 = inlined_call_operand.vmem [shape: f32[1,32], index: 5, kind: input, shape index: {}]   ;;  %s3497_s6 = inlined_call_operand.vmem [shape: bf16[32,32], index: 6, kind: input, shape index: {}]   ;;  %s3498_s7 = inlined_call_operand.hbm [shape: f32[1,32], index: 7, kind: input, shape index: {}]   ;;  %s3499_s8 = inlined_call_operand.vmem [shape: bf16[32,32], index: 8, kind: input, shape index: {}]   ;;  %s3500_s9 = inlined_call_operand.hbm [shape: f32[1,32], index: 9, kind: input, shape index: {}]   ;;  %s3501_s10 = inlined_call_operand.hbm [shape: bf16[32,32], index: 10, kind: input, shape index: {}]   ;;  %s3502_s11 = inlined_call_operand.hbm [shape: f32[1,32], index: 11, kind: input, shape index: {}]   ;;  %s3503_s12 = inlined_call_operand.hbm [shape: f32[1,32], index: 12, kind: input, shape index: {}]   ;;  %s3504_s13 = inlined_call_operand.hbm [shape: f32[1,32], index: 13, kind: input, shape index: {}]   ;;  %s3505_s14 = inlined_call_operand.hbm [shape: f32[2,8,32], index: 14, kind: output, shape index: {0}]   ;;  %s3506_s15 = inlined_call_operand.hbm [shape: f32[4,2,8,8], index: 15, kind: output, shape index: {1}]  }
   0x1   :  { %3523 = sst [smem:[#allocation31_spill]] %s3494_s3 }
   0x2   :  { %3524 = sst [smem:[#allocation32_spill]] %s3498_s7 }
   0x3   :  { %3525 = sst [smem:[#allocation33_spill]] %s3500_s9 }
   0x4   :  { %3526 = sst [smem:[#allocation34_spill]] %s3502_s11 }
   0x5   :  { %3527 = sst [smem:[#allocation35_spill]] %s3505_s14 }
   0x6   :  { %3528 = sst [smem:[#allocation36_spill]] %s3506_s15 }
   0x7   :  { %21 = vsyncpa [#allocation3], 0 }
   0x8   :  { %22 = vsyncpa [#allocation6], 0 }
   0x9   :  { %23 = vsyncpa [#allocation9], 0 }
   0xa   :  { %24 = vsyncpa [#allocation12], 0 }
   0xb   :  { %25 = vsyncpa [#allocation4], 0 }
   0xc   :  { %27 = vsyncpa [#allocation4 + $0x1], 0 }
   0xd   :  { %28 = vsyncpa [#allocation15], 0 }
   0xe   :  { %30 = vsyncpa [#allocation15 + $0x1], 0  ;;  %s2969_s18 = smov 0   ;;  %s2971_s19 = smov 0  }
   0xf   :  { %s2973_s20 = smov 0   ;;  %s2975_s21 = smov 0  }
  0x10   :  { %s2977_s22 = smov 0   ;;  %s2979_s23 = smov 0  }
  0x11 LB: > { %3529 = sst [smem:[#allocation22_spill]] %s2845_s18  ;;  %s2239_s24 = sadd.s32 4294967295, %s2865_s23   ;;  %s2865_s23 = sphi %s2979_s23, %s36_s23   ;;  %s2861_s22 = sphi %s2977_s22, %s3563_s22   ;;  %s2857_s21 = sphi %s2975_s21, %s3562_s21   ;;  %s2853_s20 = sphi %s2973_s20, %s3561_s20   ;;  %s2849_s19 = sphi %s2971_s19, %s3560_s19   ;;  %s2845_s18 = sphi %s2969_s18, %s3559_s18  }
  0x12   : > { %3530 = sst [smem:[#allocation23_spill]] %s2849_s19  ;;  %s2240_s25 = sadd.s32 4294967294, %s2865_s23  }
  0x13   : > { %3531 = sst [smem:[#allocation24_spill]] %s2853_s20  ;;  %s48_s26 = sadd.s32 1, %s2861_s22 }
  0x14   : > { %3532 = sst [smem:[#allocation25_spill]] %s2861_s22  ;;  %s375_s27 = sadd.s32 1, %s2853_s20 }
  0x15   : > { %3533 = sst [smem:[#allocation26_spill]] %s2865_s23  ;;  %p50_p0 = scmp.ge.s32.totalorder %s48_s26, 2 }
  0x16   : > { %p385_p1 = scmp.ne.s32.totalorder %s2853_s20, %s2849_s19  ;;  %p386_p2 = scmp.eq.s32.totalorder %s2239_s24, 1 }
  0x17   : > { %p391_p3 = scmp.ne.s32.totalorder %s2849_s19, %s2845_s18  ;;  %s3565_s26 = smov (%p50_p0, %s48_s26), 0 }
  0x18   : > { %3534 = sst [smem:[#allocation27_spill]] %s3565_s26  ;;  %p3009_p4 = por %p386_p2, %p385_p1 }
  0x19   : > { %p392_p5 = scmp.eq.s32.totalorder %s2240_s25, 1  ;;  %s370_s29 = ssub.s32 %s2861_s22, %s3565_s26 }
  0x1a   : > { %s3535_s28 = scalar_select %p3009_p4, 1, 0 }
  0x1b   : > { %p2241_p6 = scmp.ge.s32.totalorder %s2865_s23, 1  ;;  %p373_p7 = scmp.eq.s32.totalorder %s370_s29, 0 }
  0x1c   : > { %3536 = sst [smem:[#allocation28_spill]] %s3535_s28  ;;  %p3016_p8 = por %p392_p5, %p391_p3 }
  0x1d   : > { %p427_p9 = scmp.lt.s32.totalorder %s2865_s23, 3  ;;  %p3028_p11 = scmp.eq.s32.totalorder %s2239_s24, 0 }
  0x1e   : > { %s3537_s30 = scalar_select %p3016_p8, 1, 0 }
  0x1f   : > { %s3022_s16 = scalar_select %p373_p7, %s2853_s20, %s375_s27  }
  0x20   : > { %3538 = sst [smem:[#allocation29_spill]] %s3537_s30  ;;  %p3024_p10 = pnand %p2241_p6, %p427_p9 }
  0x21   : > { %3539 = sst [smem:[#allocation30_spill]] %s3022_s16  ;;  %s2867_s25 = smov [#allocation5]  }
  0x22   : > { %s3540_s17 = scalar_select %p3024_p10, 1, 0 }
  0x23   : > { %s3541_s18 = scalar_select %p3028_p11, 1, 0 }
  0x24   : > { %p2438_p12 = pneg %p3024_p10  ;;  %s463_s29 = sshll.u32 %s2867_s25, 4  ;;  %s464_s29 = int_to_ptr.vmem [resolvable:$true] %s463_s29 }
  0x25   : > { %s2868_s26 = smov [#allocation8]   ;;  %s3543_s9 = sld [smem:[#allocation33_spill]] }
  0x26   : > { %s487_s22 = sshll.u32 %s2868_s26, 4  ;;  %p3036_p13 = pnand %p3028_p11, %p2438_p12  ;;  %s3040_s22 = int_to_ptr.vmem [resolvable:$true] %s487_s22 }
  0x28   : > { %p3050_p1 = pneg %p3036_p13 }
  0x2b   : > { %s2571_s20 = scalar_lea.hbm %s3543_s9, 16 }
  0x2c   : > { %p2572_p0 = scmp.ne.s32.totalorder %s3543_s9, %s2571_s20  ;;  %p2578_p5 = scmp.lt.u32.totalorder %s2571_s20, %s3543_s9 }
  0x2e   : > { %p2574_p2 = pnand %p3050_p1, %p2572_p0 }
  0x30   : > { %p2575_p3 = pneg %p2574_p2 }
  0x32   : > { %p2580_p6 = pnand %p2578_p5, %p2575_p3 }
  0x34   : > { %2583 = shalt.err (!%p2580_p6)
}
  0x35   : > { %s2584_s16 = scalar_lea.vmem %s464_s29, 16  ;;  %s2591_s23 = scalar_lea.vmem %s464_s29, 32 }
  0x36   : > { %p2585_p7 = scmp.ne.s32.totalorder %s464_s29, %s2584_s16  ;;  %p2592_p8 = scmp.lt.s32.totalorder %s464_s29, %s464_s29 }
  0x37   : > { %p2593_p4 = scmp.lt.s32.totalorder %s2591_s23, %s2584_s16 }
  0x38   : > { %p2587_p9 = pnand %p2585_p7, %p3050_p1 }
  0x39   : > { %p2594_p11 = por %p2593_p4, %p2592_p8 }
  0x3a   : > { %p2588_p12 = pneg %p2587_p9 }
  0x3c   : > { %p2595_p10 = pnand %p2594_p11, %p2588_p12 }
  0x3e   : > { %2598 = shalt.err (!%p2595_p10)
}
  0x3f   : > { %2444 = dma.hbm_to_vmem [thread:$0]  (!%p3036_p13), %s3543_s9, 16, %s464_s29, [#allocation6]  }
  0x40   : > { %s3545_s11 = sld [smem:[#allocation34_spill]] }
  0x46   : > { %s2599_s26 = scalar_lea.hbm %s3545_s11, 16 }
  0x47   : > { %p2600_p0 = scmp.ne.s32.totalorder %s3545_s11, %s2599_s26  ;;  %p2606_p8 = scmp.lt.u32.totalorder %s2599_s26, %s3545_s11 }
  0x49   : > { %p2602_p2 = pnand %p2600_p0, %p3050_p1 }
  0x4b   : > { %p2603_p4 = pneg %p2602_p2 }
  0x4d   : > { %p2608_p10 = pnand %p2606_p8, %p2603_p4 }
  0x4f   : > { %2611 = shalt.err (!%p2608_p10)
}
  0x50   : > { %s2612_s29 = scalar_lea.vmem %s3040_s22, 16  ;;  %s2619_s15 = scalar_lea.vmem %s3040_s22, 32 }
  0x51   : > { %p2613_p11 = scmp.ne.s32.totalorder %s3040_s22, %s2612_s29  ;;  %p2620_p6 = scmp.lt.s32.totalorder %s3040_s22, %s3040_s22 }
  0x52   : > { %p2621_p7 = scmp.lt.s32.totalorder %s2619_s15, %s2612_s29 }
  0x53   : > { %p2615_p3 = pnand %p2613_p11, %p3050_p1 }
  0x54   : > { %p2622_p9 = por %p2621_p7, %p2620_p6 }
  0x55   : > { %p2616_p5 = pneg %p2615_p3 }
  0x57   : > { %p2623_p12 = pnand %p2622_p9, %p2616_p5 }
  0x59   : > { %2626 = shalt.err (!%p2623_p12)
}
  0x5a   : > { %2450 = dma.hbm_to_vmem [thread:$0]  (!%p3036_p13), %s3545_s11, 16, %s3040_s22, [#allocation9]  }
  0x5b   : > { %s2869_s24 = smov [#allocation2]   ;;  %s2870_s20 = smov [#allocation7]  }
  0x5c   : > { %s449_s14 = sshll.u32 %s2869_s24, 4  ;;  %s473_s26 = sshll.u32 %s2870_s20, 4  ;;  %s450_s14 = int_to_ptr.vmem [resolvable:$true] %s449_s14  ;;  %s474_s26 = int_to_ptr.vmem [resolvable:$true] %s473_s26 }
  0x5d   : > { %s3546_s7 = sld [smem:[#allocation32_spill]] }
  0x63   : > { %s2627_s29 = scalar_lea.hbm %s3546_s7, 16 }
  0x64   : > { %p2628_p0 = scmp.ne.s32.totalorder %s3546_s7, %s2627_s29  ;;  %p2634_p8 = scmp.lt.u32.totalorder %s2627_s29, %s3546_s7 }
  0x66   : > { %p2630_p2 = pnand %p2628_p0, %p3050_p1 }
  0x68   : > { %p2631_p4 = pneg %p2630_p2 }
  0x6a   : > { %p2636_p10 = pnand %p2634_p8, %p2631_p4 }
  0x6c   : > { %2639 = shalt.err (!%p2636_p10)
}
  0x6d   : > { %s2640_s22 = scalar_lea.vmem %s450_s14, 16  ;;  %s2647_s30 = scalar_lea.vmem %s450_s14, 32 }
  0x6e   : > { %p2641_p11 = scmp.ne.s32.totalorder %s450_s14, %s2640_s22  ;;  %p2648_p6 = scmp.lt.s32.totalorder %s450_s14, %s450_s14 }
  0x6f   : > { %p2649_p7 = scmp.lt.s32.totalorder %s2647_s30, %s2640_s22 }
  0x70   : > { %p2643_p3 = pnand %p2641_p11, %p3050_p1 }
  0x71   : > { %p2650_p9 = por %p2649_p7, %p2648_p6 }
  0x72   : > { %p2644_p5 = pneg %p2643_p3 }
  0x74   : > { %p2651_p12 = pnand %p2650_p9, %p2644_p5 }
  0x76   : > { %2654 = shalt.err (!%p2651_p12)
}
  0x77   : > { %2441 = dma.hbm_to_vmem [thread:$0]  (!%p3036_p13), %s3546_s7, 16, %s450_s14, [#allocation3]  }
  0x78   : > { %s2655_s16 = scalar_lea.hbm %s3501_s10, 256 }
  0x79   : > { %p2656_p0 = scmp.ne.s32.totalorder %s3501_s10, %s2655_s16  ;;  %p2662_p8 = scmp.lt.u32.totalorder %s2655_s16, %s3501_s10 }
  0x7b   : > { %p2658_p2 = pnand %p2656_p0, %p3050_p1 }
  0x7d   : > { %p2659_p4 = pneg %p2658_p2 }
  0x7f   : > { %p2664_p10 = pnand %p2662_p8, %p2659_p4 }
  0x81   : > { %2667 = shalt.err (!%p2664_p10)
}
  0x82   : > { %s2668_s22 = scalar_lea.vmem %s474_s26, 256  ;;  %p2676_p6 = scmp.lt.s32.totalorder %s474_s26, %s474_s26 }
  0x83   : > { %p2669_p11 = scmp.ne.s32.totalorder %s474_s26, %s2668_s22  ;;  %p2677_p7 = scmp.lt.s32.totalorder %s2668_s22, %s2668_s22 }
  0x85   : > { %p2671_p3 = pnand %p2669_p11, %p3050_p1  ;;  %p2678_p9 = por %p2677_p7, %p2676_p6 }
  0x87   : > { %p2672_p5 = pneg %p2671_p3 }
  0x89   : > { %p2679_p12 = pnand %p2678_p9, %p2672_p5 }
  0x8b   : > { %2682 = shalt.err (!%p2679_p12)
}
  0x8c   : > { %s2871_s14 = smov 64   ;;  %s2872_s30 = smov 4  }
  0x8d   : > { %2447 = dma.hbm_to_vmem [thread:$0]  (!%p3036_p13), %s3501_s10, 256, %s474_s26, [#allocation6], %s2871_s14, %s2871_s14, %s2872_s30  }
  0x8e   : > { %s2873_s19 = smov [#allocation10]   ;;  %s2874_s16 = smov [#allocation11]  }
  0x8f   : > { %s498_s20 = sshll.u32 %s2873_s19, 4  ;;  %s509_s23 = sshll.u32 %s2874_s16, 4  ;;  %s499_s20 = int_to_ptr.vmem [resolvable:$true] %s498_s20  ;;  %s510_s23 = int_to_ptr.vmem [resolvable:$true] %s509_s23 }
  0x90   : > { %s2683_s28 = scalar_lea.hbm %s3503_s12, 16 }
  0x91   : > { %p2684_p0 = scmp.ne.s32.totalorder %s3503_s12, %s2683_s28  ;;  %p2690_p8 = scmp.lt.u32.totalorder %s2683_s28, %s3503_s12 }
  0x93   : > { %p2686_p2 = pnand %p2684_p0, %p3050_p1 }
  0x95   : > { %p2687_p4 = pneg %p2686_p2 }
  0x97   : > { %p2692_p10 = pnand %p2690_p8, %p2687_p4 }
  0x99   : > { %2695 = shalt.err (!%p2692_p10)
}
  0x9a   : > { %s2696_s26 = scalar_lea.vmem %s499_s20, 16  ;;  %s2703_s14 = scalar_lea.vmem %s499_s20, 32 }
  0x9b   : > { %p2697_p11 = scmp.ne.s32.totalorder %s499_s20, %s2696_s26  ;;  %p2704_p6 = scmp.lt.s32.totalorder %s499_s20, %s499_s20 }
  0x9c   : > { %p2705_p7 = scmp.lt.s32.totalorder %s2703_s14, %s2696_s26 }
  0x9d   : > { %p2699_p3 = pnand %p2697_p11, %p3050_p1 }
  0x9e   : > { %p2706_p9 = por %p2705_p7, %p2704_p6 }
  0x9f   : > { %p2700_p5 = pneg %p2699_p3 }
  0xa1   : > { %p2707_p12 = pnand %p2706_p9, %p2700_p5 }
  0xa3   : > { %2710 = shalt.err (!%p2707_p12)
}
  0xa4   : > { %2453 = dma.hbm_to_vmem [thread:$0]  (!%p3036_p13), %s3503_s12, 16, %s499_s20, [#allocation9]  }
  0xa5   : > { %s2711_s9 = scalar_lea.hbm %s3504_s13, 16 }
  0xa6   : > { %p2712_p0 = scmp.ne.s32.totalorder %s3504_s13, %s2711_s9  ;;  %p2718_p8 = scmp.lt.u32.totalorder %s2711_s9, %s3504_s13 }
  0xa8   : > { %p2714_p2 = pnand %p2712_p0, %p3050_p1 }
  0xaa   : > { %p2715_p4 = pneg %p2714_p2 }
  0xac   : > { %p2720_p10 = pnand %p2718_p8, %p2715_p4 }
  0xae   : > { %2723 = shalt.err (!%p2720_p10)
}
  0xaf   : > { %s2724_s15 = scalar_lea.vmem %s510_s23, 16  ;;  %s2731_s20 = scalar_lea.vmem %s510_s23, 32 }
  0xb0   : > { %p2725_p11 = scmp.ne.s32.totalorder %s510_s23, %s2724_s15  ;;  %p2732_p6 = scmp.lt.s32.totalorder %s510_s23, %s510_s23 }
  0xb1   : > { %p2733_p7 = scmp.lt.s32.totalorder %s2731_s20, %s2724_s15 }
  0xb2   : > { %p2727_p3 = pnand %p2725_p11, %p3050_p1 }
  0xb3   : > { %p2734_p9 = por %p2733_p7, %p2732_p6 }
  0xb4   : > { %p2728_p5 = pneg %p2727_p3 }
  0xb6   : > { %p2735_p12 = pnand %p2734_p9, %p2728_p5 }
  0xb8   : > { %2738 = shalt.err (!%p2735_p12)
}
  0xb9   : > { %2456 = dma.hbm_to_vmem [thread:$0]  (!%p3036_p13), %s3504_s13, 16, %s510_s23, [#allocation12]  }
  0xba   : > { %p3547_p0 = scmp.ne.s32.totalorder %s3540_s17, 0 }
  0xbb   : > { %p3548_p2 = scmp.ne.s32.totalorder (!%p3547_p0), %s3541_s18, 0 }
  0xbc   : > { %556 = sbr.rel (%p3547_p0) target bundleno = 2052 (0x804), region = 76 }
  0xc3   : > { %2820 = dma.done.wait (%p3548_p2), [#allocation3], 16  }
  0xc4   : > { %2822 = vsyncadd (%p3548_p2), [#allocation3], 4294967280 }
  0xc5   : > { %2824 = dma.done.wait (%p3548_p2), [#allocation6], 272  }
  0xc6   : > { %2826 = vsyncadd (%p3548_p2), [#allocation6], 4294967024 }
  0xc7   : > { %2828 = dma.done.wait (%p3548_p2), [#allocation9], 32  }
  0xc8   : > { %2830 = vsyncadd (%p3548_p2), [#allocation9], 4294967264 }
  0xc9   : > { %2832 = dma.done.wait (%p3548_p2), [#allocation12], 16  }
  0xca   : > { %2834 = vsyncadd (%p3548_p2), [#allocation12], 4294967280  ;;  %p646_p13 = scmp.lt.s32.totalorder %s2857_s21, 1  ;;  %v2875_v0 = vmov 0.0   ;;  %vm2876_vm0 = vmmov 0   ;;  %v2545_v1 = vld [vmem:[%s3497_s6] sm:$0xff]   ;;  %v891_v27 = vlaneseq }
  0xcb   : > { %2338 = vmatprep.subr.bf16.mxu1 %v2875_v0  ;;  %2330 = vmatprep.subr.bf16.mxu0 %v2875_v0  ;;  %v2546_v2 = vld [vmem:[%s3495_s4] sm:$0xff]   ;;  %v2547_v3 = vld [vmem:[%s3497_s6 + $0x8] sm:$0xff]   ;;  %vm698_vm1 = vcmask 261120   ;;  %s2877_s27 = smov 104   ;;  %s2878_s25 = smov 120   ;;  %vm1326_vm2 = vcmask 64512  }
  0xcc   : > { %2342 = vmatprep.mubr.msk.bf16.mxu1 %vm2876_vm0, %v2875_v0  ;;  %s3186_s17 = scalar_select %p646_p13, %s2857_s21, 1  ;;  %2334 = vmatprep.mubr.msk.bf16.mxu0 %vm2876_vm0, %v2875_v0  ;;  %v2548_v5 = vld [vmem:[%s3495_s4 + $0x8] sm:$0xff]   ;;  %v2266_v9 = vld [vmem:[#allocation2] ss:$0 sm:$0xff]  ;;  %v2880_v25 = vmov 1983009808  }
  0xcd   : > { %2339 = vmatpush3.bf16.msra.mxu1 %v2545_v1  ;;  %2331 = vmatpush3.bf16.msra.mxu0 %v2546_v2  ;;  %v2262_v11 = vld [vmem:[%s3496_s5] ss:$0 sm:$0xff]  ;;  %v2550_v22 = vld [vmem:[%s3499_s8 + $0x8] sm:$0xff]   ;;  %v889_v26 = vunpack.c.l.s4 %v2880_v25  ;;  %v2881_v28 = vmov 1934713408   ;;  %v892_v31 = vshrl.u32 %v891_v27, 7 }
  0xce   : > { %s3191_s18 = sshll.u32 %s3186_s17, 3  ;;  %2340 = vmatprep.subr.bf16.mxu1 %v2875_v0  ;;  %2332 = vmatprep.subr.bf16.mxu0 %v2875_v0  ;;  %v2549_v15 = vld [vmem:[%s3499_s8] sm:$0xff]   ;;  %v921_v29 = vunpack.c.l.s4 %v2881_v28  ;;  %s3549_s24 = sld [smem:[#allocation31_spill]]  ;;  %vm1566_vm3 = vcmask 1043456   ;;  %vm1897_vm4 = vcmask 130048   ;;  %vm1899_vm5 = vcmask 195584  }
  0xcf   : > { %s656_s14 = scalar_lea.vmem %s3492_s1, %s3191_s18  ;;  %s652_s9 = scalar_lea.vmem %s3491_s0, %s3191_s18  ;;  %v890_v30 = vunpack.c.0.s8 %v889_v26 }
  0xd0   : > { %v670_v4 = vld [vmem:[%s656_s14] sm:$0xff]  ;;  %s2879_s14 = smov 112   ;;  %s660_s3 = scalar_lea.vmem %s3493_s2, %s3191_s18  ;;  %v922_v34 = vunpack.c.0.s8 %v921_v29 }
  0xd1   : > { %v3215_v6 = vld [vmem:[%s652_s9] sm:$0xff]  ;;  %v742_v7 = vpack.c.bf16 %v670_v4, %v670_v4  ;;  %2341 = vmatpush3.bf16.msra.mxu1 %v2547_v3  ;;  %2333 = vmatpush3.bf16.msra.mxu0 %v2548_v5  ;;  %v3251_v35 = vsub.s32 %v890_v30, %v892_v31  ;;  %s2261_s18 = sshll.u32 %s3186_s17, 2  ;;  %s3550_s17 = sld [smem:[#allocation23_spill]] }
  0xd2   : > { %v674_v8 = vpack.c.bf16 %v3215_v6, %v3215_v6  ;;  %2354 = vmatprep.subr.bf16.mxu1 %v2875_v0  ;;  %2346 = vmatprep.subr.bf16.mxu0 %v2875_v0  ;;  %v671_v23 = vld [vmem:[%s660_s3] sm:$0xff]  ;;  %v3253_v42 = vsub.s32 %v922_v34, %v892_v31  ;;  %s2882_s20 = smov 16   ;;  %s2883_s28 = smov 8  }
  0xd3   : > { %v809_v24 = vpack.c.bf16 %v671_v23, %v671_v23  ;;  %s2884_s22 = smov 24   ;;  %s2885_s11 = smov [#allocation14]  }
  0xd4   : > { %2343 = vmatmul.mubr.msk.bf16.vlgmr.msra.gmra.mrb[0].mxu1 %vm698_vm1, %v742_v7  ;;  %2335 = vmatmul.mubr.msk.bf16.vlgmr.msra.gmra.mrb[0].mxu0 %vm698_vm1, %v674_v8  ;;  %s667_s19 = scalar_lea.vmem %s3549_s24, %s2261_s18  ;;  %s2743_s9 = sshll.u32 %s2885_s11, 4  ;;  %s2744_s9 = int_to_ptr.vmem [resolvable:$false] %s2743_s9 }
  0xd5   : > { %2356 = vmatprep.mubr.msk.bf16.mxu1 %vm2876_vm0, %v2875_v0  ;;  %2350 = vmatprep.mubr.msk.bf16.mxu0 %vm2876_vm0, %v2875_v0  ;;  %s2745_s24 = scalar_lea.vmem %s2744_s9, 1024 }
  0xd6   : > { %2347 = vmatpush3.bf16.msra.mxu0 %v2549_v15 }
  0xd7   : > { %2348 = vmatprep.subr.bf16.mxu0 %v2875_v0  ;;  %s3329_s16 = sand.u32 1, %s3550_s17  }
  0xd8   : > { %s2257_s29 = sshll.u32 %s3329_s16, 5  ;;  %s2006_s3 = scalar_lea.sflag [#allocation15], %s3329_s16 }
  0xd9   : > { %s3340_s15 = scalar_lea.vmem [#allocation14], %s2257_s29 }
  0xda   : > { %2349 = vmatpush3.bf16.msra.mxu0 %v2550_v22  ;;  %s2033_s30 = sshll.u32 %s3340_s15, 4  ;;  %s3409_s30 = int_to_ptr.vmem [resolvable:$true] %s2033_s30 }
  0xdb   : > { %2360 = vmatprep.subr.bf16.mxu0 %v2875_v0  ;;  %s2739_s18 = scalar_lea.vmem %s3409_s30, 512  ;;  %p2746_p11 = scmp.lt.s32.totalorder %s3409_s30, %s2744_s9 }
  0xdc   : > { %p2740_p1 = scmp.ne.s32.totalorder %s3409_s30, %s2739_s18  ;;  %p2747_p3 = scmp.lt.s32.totalorder %s2745_s24, %s2739_s18 }
  0xdd   : > { %2351 = vmatmul.mubr.msk.bf16.vlgmr.msra.gmra.mrb[4].mxu0 %vm698_vm1, %v809_v24 }
  0xde   : > { %2362 = vmatprep.mubr.msk.bf16.mxu0 %vm2876_vm0, %v2875_v0  ;;  %p2748_p5 = por %p2747_p3, %p2746_p11 }
 0x1a7   : > { %v803_v10 = vpop.f32.mrb[0].mxu1  ;;  %v736_v14 = vpop.f32.mrb[0].mxu0 }
 0x1a8   : > { %v804_v12 = vadd.f32 %v2266_v9, %v803_v10  ;;  %v2344_v13 = vpop.f32.mrb[1].mxu1  ;;  %v2336_v17 = vpop.f32.mrb[1].mxu0  ;;  %v737_v19 = vadd.f32 %v2262_v11, %v736_v14 }
 0x1a9   : > { %v806_v16 = vpop.f32.mrb[2].mxu1  ;;  %v739_v20 = vpop.f32.mrb[2].mxu0 }
 0x1aa   : > { %1033 = vrot.lane.b32.xlu1 %v804_v12, %s2877_s27  ;;  %1027 = vrot.lane.b32.xlu0 %v804_v12, %s2878_s25  ;;  %v2345_v18 = vpop.f32.mrb[3].mxu1  ;;  %v2337_v21 = vpop.f32.mrb[3].mxu0 }
 0x1ae   : > { %1030 = vrot.lane.b32.xlu0 %v804_v12, %s2879_s14  ;;  %877 = vrot.lane.b32.xlu1 %v737_v19, %s2878_s25 }
 0x1b2   : > { %880 = vrot.lane.b32.xlu0 %v737_v19, %s2879_s14  ;;  %883 = vrot.lane.b32.xlu1 %v737_v19, %s2877_s27 }
 0x21c   : > { %v1034_v32 = vpop.permute.xlu1 %1033  ;;  %v1028_v33 = vpop.permute.xlu0 %1027 }
 0x21d   : > { %v1052_v36 = vcombine.low %v1028_v33, %v1034_v32  ;;  %v1053_v37 = vcombine.high %v1028_v33, %v1034_v32 }
 0x21f   : > { %v1060_v43 = vrot.slane %v1052_v36, %v3251_v35  ;;  %v1067_v44 = vrot.slane %v1053_v37, %v3251_v35 }
 0x220   : > { %v1031_v38 = vpop.permute.xlu0 %1030  ;;  %v878_v39 = vpop.permute.xlu1 %877 }
 0x221   : > { %v1036_v40 = vcombine.low %v804_v12, %v1031_v38  ;;  %v1037_v41 = vcombine.high %v804_v12, %v1031_v38 }
 0x223   : > { %v1044_v45 = vrot.slane %v1036_v40, %v3251_v35  ;;  %v1051_v46 = vrot.slane %v1037_v41, %v3251_v35 }
 0x224   : > { %v881_v47 = vpop.permute.xlu0 %880  ;;  %v884_v48 = vpop.permute.xlu1 %883 }
 0x225   : > { %v1068_v49 = vcombine.low %v1044_v45, %v1060_v43  ;;  %v1069_v50 = vcombine.high %v1044_v45, %v1060_v43  ;;  %v1084_v51 = vcombine.low %v1051_v46, %v1067_v44  ;;  %v1085_v52 = vcombine.high %v1051_v46, %v1067_v44 }
 0x226   : > { %v886_v53 = vcombine.low %v737_v19, %v881_v47  ;;  %v887_v54 = vcombine.high %v737_v19, %v881_v47  ;;  %v902_v55 = vcombine.low %v878_v39, %v884_v48  ;;  %v903_v56 = vcombine.high %v878_v39, %v884_v48 }
 0x227   : > { %v1076_v57 = vrot.slane %v1068_v49, %v3253_v42  ;;  %v1083_v58 = vrot.slane %v1069_v50, %v3253_v42  ;;  %v1092_v59 = vrot.slane %v1084_v51, %v3253_v42  ;;  %v1099_v60 = vrot.slane %v1085_v52, %v3253_v42 }
 0x228   : > { %v894_v61 = vrot.slane %v886_v53, %v3251_v35  ;;  %v901_v62 = vrot.slane %v887_v54, %v3251_v35  ;;  %v910_v63 = vrot.slane %v902_v55, %v3251_v35  ;;  %v917_v1 = vrot.slane %v903_v56, %v3251_v35 }
 0x229   : > { %v1104_v2 = vcombine.low %v1076_v57, %v1083_v58  ;;  %v2276_v3 = vcombine.high %v1076_v57, %v1083_v58  ;;  %v1120_v4 = vcombine.low %v1092_v59, %v1099_v60  ;;  %v2277_v5 = vcombine.high %v1092_v59, %v1099_v60 }
 0x22a   : > { %v918_v7 = vcombine.low %v894_v61, %v910_v63  ;;  %v919_v8 = vcombine.high %v894_v61, %v910_v63  ;;  %v934_v9 = vcombine.low %v901_v62, %v917_v1  ;;  %v935_v10 = vcombine.high %v901_v62, %v917_v1 }
 0x22b   : > { %v1111_v11 = vrot.slane %v1104_v2, %v3251_v35  ;;  %v1119_v12 = vrot.slane %v2276_v3, %v3251_v35  ;;  %v1127_v13 = vrot.slane %v1120_v4, %v3251_v35  ;;  %v1135_v14 = vrot.slane %v2277_v5, %v3251_v35  ;;  %v870_v2 = vpop.f32.mrb[4].mxu0 }
 0x22c   : > { %v926_v15 = vrot.slane %v918_v7, %v3253_v42  ;;  %v933_v16 = vrot.slane %v919_v8, %v3253_v42  ;;  %v942_v17 = vrot.slane %v934_v9, %v3253_v42  ;;  %v949_v18 = vrot.slane %v935_v10, %v3253_v42  ;;  %v2352_v3 = vpop.f32.mrb[5].mxu0  ;;  %v672_v7 = vld [vmem:[%s667_s19] sm:$0xf] }
 0x22d   : > { %v1136_v19 = vcombine.low %v1111_v11, %v1119_v12  ;;  %v1152_v20 = vcombine.low %v1127_v13, %v1135_v14  ;;  %v1137_v21 = vcombine.high %v1111_v11, %v1119_v12  ;;  %v1153_v22 = vcombine.high %v1127_v13, %v1135_v14  ;;  %v873_v4 = vpop.f32.mrb[6].mxu0 }
 0x22e   : > { %v954_v23 = vcombine.low %v926_v15, %v933_v16  ;;  %v2274_v24 = vcombine.high %v926_v15, %v933_v16  ;;  %v970_v25 = vcombine.low %v942_v17, %v949_v18  ;;  %v2275_v26 = vcombine.high %v942_v17, %v949_v18  ;;  %v2353_v5 = vpop.f32.mrb[7].mxu0 }
 0x22f   : > { %v1144_v27 = vrot.slane %v1136_v19, %v3253_v42  ;;  %v1160_v28 = vrot.slane %v1152_v20, %v3253_v42  ;;  %v1151_v36 = vrot.slane %v1137_v21, %v3253_v42  ;;  %v1167_v37 = vrot.slane %v1153_v22, %v3253_v42 }
 0x230   : > { %v961_v29 = vrot.slane %v954_v23, %v3251_v35  ;;  %v969_v30 = vrot.slane %v2274_v24, %v3251_v35  ;;  %v977_v31 = vrot.slane %v970_v25, %v3251_v35  ;;  %v985_v32 = vrot.slane %v2275_v26, %v3251_v35 }
 0x231   : > { %v1168_v33 = vcombine.low %v1144_v27, %v1160_v28  ;;  %v1169_v34 = vcombine.high %v1144_v27, %v1160_v28  ;;  %v1170_v47 = vcombine.low %v1151_v36, %v1167_v37  ;;  %v1171_v48 = vcombine.high %v1151_v36, %v1167_v37 }
 0x232   : > { %v986_v38 = vcombine.low %v961_v29, %v969_v30  ;;  %v1002_v39 = vcombine.low %v977_v31, %v985_v32  ;;  %v987_v49 = vcombine.high %v961_v29, %v969_v30  ;;  %v1003_v50 = vcombine.high %v977_v31, %v985_v32 }
 0x233   : > { %v1172_v40 = vpack.c.bf16 %v1168_v33, %v1168_v33  ;;  %v1173_v41 = vpack.c.bf16 %v1169_v34, %v1169_v34  ;;  %v1174_v53 = vpack.c.bf16 %v1170_v47, %v1170_v47  ;;  %v1175_v54 = vpack.c.bf16 %v1171_v48, %v1171_v48  ;;  %v2270_v33 = vld [vmem:[#allocation5] ss:$0 sm:$0xff] }
 0x234   : > { %v994_v43 = vrot.slane %v986_v38, %v3253_v42  ;;  %v1010_v44 = vrot.slane %v1002_v39, %v3253_v42  ;;  %v1001_v57 = vrot.slane %v987_v49, %v3253_v42  ;;  %v1017_v58 = vrot.slane %v1003_v50, %v3253_v42 }
 0x235   : > { %v1331_v45 = vsel %vm1326_vm2, %v1172_v40, 0  ;;  %v1377_v46 = vsel %vm1326_vm2, %v1173_v41, 0  ;;  %v1423_v59 = vsel %vm1326_vm2, %v1174_v53, 0  ;;  %v1469_v60 = vsel %vm1326_vm2, %v1175_v54, 0 }
 0x236   : > { %2355 = vmatpush3.bf16.xpose.msra.mxu1 %v1331_v45  ;;  %2361 = vmatpush3.bf16.xpose.msra.mxu0 %v1377_v46  ;;  %v1018_v51 = vcombine.low %v994_v43, %v1010_v44  ;;  %v1019_v52 = vcombine.high %v994_v43, %v1010_v44  ;;  %v1020_v61 = vcombine.low %v1001_v57, %v1017_v58  ;;  %v673_v8 = vunpack.c.l.bf16 %v672_v7 }
 0x237   : > { %2366 = vmatprep.subr.bf16.mxu1 %v2875_v0  ;;  %2372 = vmatprep.subr.bf16.mxu0 %v2875_v0  ;;  %v1021_v62 = vcombine.high %v1001_v57, %v1017_v58  ;;  %v871_v34 = vadd.f32 %v2270_v33, %v870_v2 }
 0x238   : > { %v1022_v55 = vpack.c.bf16 %v1018_v51, %v1018_v51  ;;  %v1023_v56 = vpack.c.bf16 %v1019_v52, %v1019_v52  ;;  %v1024_v63 = vpack.c.bf16 %v1020_v61, %v1020_v61 }
 0x239   : > { %v1025_v1 = vpack.c.bf16 %v1021_v62, %v1021_v62 }
 0x23d   : > { %2357 = vmatmul.mubr.msk.bf16.vlgmr.msra.gmra.mrb[4].mxu1 %vm1326_vm2, %v1022_v55  ;;  %2363 = vmatmul.mubr.msk.bf16.vlgmr.msra.gmra.mrb[8].mxu0 %vm1326_vm2, %v1023_v56 }
 0x23e   : > { %2367 = vmatpush3.bf16.xpose.msra.mxu1 %v1423_v59  ;;  %2373 = vmatpush3.bf16.xpose.msra.mxu0 %v1469_v60 }
 0x23f   : > { %2368 = vmatprep.mubr.msk.bf16.mxu1 %vm2876_vm0, %v2875_v0  ;;  %2374 = vmatprep.mubr.msk.bf16.mxu0 %vm2876_vm0, %v2875_v0 }
 0x240   : > { %2378 = vmatprep.subr.bf16.mxu1 %v2875_v0  ;;  %2384 = vmatprep.subr.bf16.mxu0 %v2875_v0 }
 0x245   : > { %2369 = vmatmul.mubr.msk.bf16.vlgmr.msra.gmra.mrb[8].mxu1 %vm1326_vm2, %v1024_v63  ;;  %2375 = vmatmul.mubr.msk.bf16.vlgmr.msra.gmra.mrb[12].mxu0 %vm1326_vm2, %v1025_v1 }
 0x246   : > { %2380 = vmatprep.mubr.msk.bf16.mxu1 %vm2876_vm0, %v2875_v0  ;;  %2386 = vmatprep.mubr.msk.bf16.mxu0 %vm2876_vm0, %v2875_v0 }
 0x310   : > { %v1367_v9 = vpop.f32.mrb[4].mxu1  ;;  %v1413_v10 = vpop.f32.mrb[8].mxu0 }
 0x311   : > { %v1368_v11 = vadd.f32 %v1367_v9, %v673_v8  ;;  %v1414_v12 = vadd.f32 %v1413_v10, %v673_v8  ;;  %v2358_v13 = vpop.f32.mrb[5].mxu1  ;;  %v2364_v14 = vpop.f32.mrb[9].mxu0 }
 0x312   : > { %v1370_v15 = vpop.f32.mrb[6].mxu1  ;;  %v1416_v16 = vpop.f32.mrb[10].mxu0 }
 0x313   : > { %v2359_v17 = vpop.f32.mrb[7].mxu1  ;;  %v2365_v18 = vpop.f32.mrb[11].mxu0  ;;  %v1511_v19 = vsel %vm1326_vm2, %v1368_v11, -inf  ;;  %v1514_v20 = vsel %vm1326_vm2, %v1414_v12, -inf }
 0x314   : > { %1512 = vmax.xlane.f32.xlu0 %v1511_v19  ;;  %1515 = vmax.xlane.f32.xlu1 %v1514_v20 }
 0x318   : > { %v1459_v21 = vpop.f32.mrb[8].mxu1  ;;  %v1505_v22 = vpop.f32.mrb[12].mxu0 }
 0x319   : > { %v1460_v23 = vadd.f32 %v1459_v21, %v673_v8  ;;  %v2370_v24 = vpop.f32.mrb[9].mxu1  ;;  %v2376_v25 = vpop.f32.mrb[13].mxu0  ;;  %v1506_v28 = vadd.f32 %v1505_v22, %v673_v8 }
 0x31a   : > { %v1462_v26 = vpop.f32.mrb[10].mxu1  ;;  %v1508_v27 = vpop.f32.mrb[14].mxu0 }
 0x31b   : > { %v2371_v29 = vpop.f32.mrb[11].mxu1  ;;  %v2377_v30 = vpop.f32.mrb[15].mxu0  ;;  %v1517_v31 = vsel %vm1326_vm2, %v1460_v23, -inf  ;;  %v1520_v32 = vsel %vm1326_vm2, %v1506_v28, -inf }
 0x31c   : > { %1518 = vmax.xlane.f32.xlu0 %v1517_v31 }
 0x320   : > { %1521 = vmax.xlane.f32.xlu0 %v1520_v32 }
 0x325   : > { %1177 = vrot.lane.b32.xlu1 %v871_v34, %s2878_s25  ;;  %s2298_s25 = sshll.u32 %s2857_s21, 7 }
 0x3a1   : > { %v1513_v36 = vpop.xlane.xlu0 %1512  ;;  %v1516_v37 = vpop.xlane.xlu1 %1515 }
 0x3a2   : > { %v1523_v38 = vsub.f32 %v1368_v11, %v1513_v36  ;;  %v1524_v39 = vsub.f32 %v1414_v12, %v1516_v37 }
 0x3a4   : > { %v1527_v40 = vmul.f32 1.442695, %v1523_v38  ;;  %v1529_v41 = vmul.f32 1.442695, %v1524_v39 }
 0x3a5   : > { %v1178_v57 = vpop.permute.xlu1 %1177 }
 0x3a6   : > { %2553 = vpow2.f32 %v1527_v40 }
 0x3a7   : > { %2555 = vpow2.f32 %v1529_v41 }
 0x3a9   : > { %v1519_v47 = vpop.xlane.xlu0 %1518 }
 0x3aa   : > { %v1525_v49 = vsub.f32 %v1460_v23, %v1519_v47 }
 0x3ac   : > { %v1531_v51 = vmul.f32 1.442695, %v1525_v49 }
 0x3ad   : > { %v1522_v48 = vpop.xlane.xlu0 %1521 }
 0x3ae   : > { %v1526_v50 = vsub.f32 %v1506_v28, %v1522_v48  ;;  %2557 = vpow2.f32 %v1531_v51 }
 0x3b0   : > { %v2554_v43 = vpop.eup %2553  ;;  %v1533_v52 = vmul.f32 1.442695, %v1526_v50 }
 0x3b1   : > { %v2556_v44 = vpop.eup %2555  ;;  %v1535_v45 = vsel %vm1326_vm2, %v2554_v43, 0.0 }
 0x3b2   : > { %1536 = vadd.xlane.f32.xlu1 %v1535_v45  ;;  %v1538_v46 = vsel %vm1326_vm2, %v2556_v44, 0.0  ;;  %2559 = vpow2.f32 %v1533_v52 }
 0x3b3   : > { %1539 = vadd.xlane.f32.xlu0 %v1538_v46 }
 0x3b8   : > { %v3320_v53 = vpop.eup %2557 }
 0x3b9   : > { %v1541_v55 = vsel %vm1326_vm2, %v3320_v53, 0.0 }
 0x3bc   : > { %v3322_v54 = vpop.eup %2559 }
 0x3bd   : > { %v1544_v56 = vsel %vm1326_vm2, %v3322_v54, 0.0 }
 0x3c3   : > { %1183 = vrot.lane.b32.xlu1 %v871_v34, %s2877_s27  ;;  %s3551_s27 = sld [smem:[#allocation28_spill]] }
 0x3c9   : > { %1180 = vrot.lane.b32.xlu0 %v871_v34, %s2879_s14  ;;  %s3552_s14 = sld [smem:[#allocation36_spill]]  ;;  %p3553_p4 = scmp.ne.s32.totalorder %s3551_s27, 0 }
 0x3cb   : > { %p2741_p8 = pnand %p2740_p1, %p3553_p4 }
 0x3cd   : > { %p2742_p10 = pneg %p2741_p8 }
 0x3cf   : > { %s3406_s7 = scalar_lea.hbm %s3552_s14, %s2298_s25  ;;  %p2749_p6 = pnand %p2748_p5, %p2742_p10 }
 0x3e7   : > { %1542 = vadd.xlane.f32.xlu1 %v1541_v55 }
 0x3e8   : > { %1545 = vadd.xlane.f32.xlu0 %v1544_v56 }
 0x43f   : > { %v1537_v58 = vpop.xlane.xlu1 %1536 }
 0x440   : > { %2561 = vrcp.f32 %v1537_v58  ;;  %v1540_v59 = vpop.xlane.xlu0 %1539 }
 0x441   : > { %2563 = vrcp.f32 %v1540_v59 }
 0x443   : > { %v1184_v60 = vpop.permute.xlu1 %1183 }
 0x444   : > { %v1202_v61 = vcombine.low %v1178_v57, %v1184_v60  ;;  %v1203_v62 = vcombine.high %v1178_v57, %v1184_v60  ;;  %v1181_v63 = vpop.permute.xlu0 %1180 }
 0x445   : > { %v1186_v1 = vcombine.low %v871_v34, %v1181_v63  ;;  %v1187_v2 = vcombine.high %v871_v34, %v1181_v63 }
 0x446   : > { %v1210_v3 = vrot.slane %v1202_v61, %v3251_v35  ;;  %v1217_v4 = vrot.slane %v1203_v62, %v3251_v35 }
 0x447   : > { %v1194_v5 = vrot.slane %v1186_v1, %v3251_v35  ;;  %v1201_v7 = vrot.slane %v1187_v2, %v3251_v35 }
 0x449   : > { %v1218_v8 = vcombine.low %v1194_v5, %v1210_v3  ;;  %v1219_v9 = vcombine.high %v1194_v5, %v1210_v3  ;;  %v1234_v10 = vcombine.low %v1201_v7, %v1217_v4  ;;  %v1235_v11 = vcombine.high %v1201_v7, %v1217_v4 }
 0x44a   : > { %v2562_v12 = vpop.eup %2561 }
 0x44b   : > { %v2564_v13 = vpop.eup %2563  ;;  %v1551_v14 = vmul.f32 %v2562_v12, %v2554_v43  ;;  %v1226_v15 = vrot.slane %v1218_v8, %v3253_v42  ;;  %v1233_v16 = vrot.slane %v1219_v9, %v3253_v42  ;;  %v1242_v17 = vrot.slane %v1234_v10, %v3253_v42 }
 0x44c   : > { %v1552_v18 = vmul.f32 %v2564_v13, %v2556_v44  ;;  %v1249_v19 = vrot.slane %v1235_v11, %v3253_v42 }
 0x44d   : > { %v1254_v20 = vcombine.low %v1226_v15, %v1233_v16  ;;  %v2278_v21 = vcombine.high %v1226_v15, %v1233_v16  ;;  %1555 = vst.msk [vmem:[%s3340_s15] sm:$0xff] %vm1326_vm2, %v1551_v14  ;;  %v1559_v48 = vpack.c.bf16 %v1551_v14, %v1551_v14 }
 0x44e   : > { %v1270_v22 = vcombine.low %v1242_v17, %v1249_v19  ;;  %v2279_v23 = vcombine.high %v1242_v17, %v1249_v19  ;;  %1556 = vst.msk [vmem:[%s3340_s15 + $0x8] sm:$0xff] %vm1326_vm2, %v1552_v18  ;;  %v1560_v49 = vpack.c.bf16 %v1552_v18, %v1552_v18 }
 0x44f   : > { %v1261_v24 = vrot.slane %v1254_v20, %v3251_v35  ;;  %v1269_v25 = vrot.slane %v2278_v21, %v3251_v35 }
 0x450   : > { %v1277_v26 = vrot.slane %v1270_v22, %v3251_v35  ;;  %v1285_v27 = vrot.slane %v2279_v23, %v3251_v35 }
 0x451   : > { %v1286_v28 = vcombine.low %v1261_v24, %v1269_v25  ;;  %v1287_v29 = vcombine.high %v1261_v24, %v1269_v25 }
 0x452   : > { %v1302_v30 = vcombine.low %v1277_v26, %v1285_v27  ;;  %v1303_v31 = vcombine.high %v1277_v26, %v1285_v27  ;;  %v2551_v26 = vld [vmem:[#allocation7] sm:$0xff]  }
 0x453   : > { %v1294_v32 = vrot.slane %v1286_v28, %v3253_v42  ;;  %v1301_v33 = vrot.slane %v1287_v29, %v3253_v42 }
 0x454   : > { %v1310_v34 = vrot.slane %v1302_v30, %v3253_v42  ;;  %v1317_v36 = vrot.slane %v1303_v31, %v3253_v42 }
 0x456   : > { %v1318_v37 = vcombine.low %v1294_v32, %v1310_v34  ;;  %v1319_v38 = vcombine.high %v1294_v32, %v1310_v34  ;;  %v1320_v39 = vcombine.low %v1301_v33, %v1317_v36  ;;  %v1321_v40 = vcombine.high %v1301_v33, %v1317_v36  ;;  %v2552_v36 = vld [vmem:[#allocation7 + $0x8] sm:$0xff]  }
 0x458   : > { %v1322_v41 = vpack.c.bf16 %v1318_v37, %v1318_v37  ;;  %v1323_v43 = vpack.c.bf16 %v1319_v38, %v1319_v38  ;;  %v1324_v46 = vpack.c.bf16 %v1320_v39, %v1320_v39  ;;  %v1325_v47 = vpack.c.bf16 %v1321_v40, %v1321_v40 }
 0x45a   : > { %v1568_v44 = vsel %vm1566_vm3, %v1322_v41, 0  ;;  %v1614_v45 = vsel %vm1566_vm3, %v1323_v43, 0  ;;  %v1660_v50 = vsel %vm1566_vm3, %v1324_v46, 0  ;;  %v1706_v51 = vsel %vm1566_vm3, %v1325_v47, 0 }
 0x45b   : > { %2379 = vmatpush3.bf16.msra.mxu1 %v1568_v44  ;;  %2385 = vmatpush3.bf16.msra.mxu0 %v1614_v45 }
 0x45c   : > { %2390 = vmatprep.subr.bf16.mxu1 %v2875_v0  ;;  %2396 = vmatprep.subr.bf16.mxu0 %v2875_v0 }
 0x45e   : > { %2381 = vmatmul.mubr.msk.bf16.vlgmr.msra.gmra.mrb[12].mxu1 %vm1326_vm2, %v1559_v48  ;;  %2387 = vmatmul.mubr.msk.bf16.vlgmr.msra.gmra.mrb[16].mxu0 %vm1326_vm2, %v1560_v49 }
 0x45f   : > { %2391 = vmatpush3.bf16.msra.mxu1 %v1660_v50  ;;  %2397 = vmatpush3.bf16.msra.mxu0 %v1706_v51 }
 0x460   : > { %2392 = vmatprep.mubr.msk.bf16.mxu1 %vm2876_vm0, %v2875_v0  ;;  %2398 = vmatprep.mubr.msk.bf16.mxu0 %vm2876_vm0, %v2875_v0 }
 0x461   : > { %2402 = vmatprep.subr.bf16.mxu1 %v2875_v0 }
 0x474   : > { %v1543_v52 = vpop.xlane.xlu1 %1542 }
 0x475   : > { %2565 = vrcp.f32 %v1543_v52  ;;  %v1546_v55 = vpop.xlane.xlu0 %1545 }
 0x476   : > { %2567 = vrcp.f32 %v1546_v55 }
 0x47f   : > { %v2566_v56 = vpop.eup %2565 }
 0x480   : > { %v2568_v57 = vpop.eup %2567  ;;  %v1553_v58 = vmul.f32 %v2566_v56, %v3320_v53 }
 0x481   : > { %v1554_v59 = vmul.f32 %v2568_v57, %v3322_v54 }
 0x482   : > { %v1561_v60 = vpack.c.bf16 %v1553_v58, %v1553_v58  ;;  %1557 = vst.msk [vmem:[%s3340_s15 + $0x10] sm:$0xff] %vm1326_vm2, %v1553_v58 }
 0x483   : > { %v1562_v61 = vpack.c.bf16 %v1554_v59, %v1554_v59  ;;  %1558 = vst.msk [vmem:[%s3340_s15 + $0x18] sm:$0xff] %vm1326_vm2, %v1554_v59 }
 0x484   : > { %2393 = vmatmul.mubr.msk.bf16.vlgmr.msra.gmra.mrb[16].mxu1 %vm1326_vm2, %v1561_v60  ;;  %v2290_v60 = vld [vmem:[#allocation8] ss:$0 sm:$0xff] }
 0x485   : > { %2399 = vmatmul.mubr.msk.bf16.vlgmr.msra.gmra.mrb[20].mxu0 %vm1326_vm2, %v1562_v61  ;;  %2406 = vmatprep.mubr.msk.bf16.mxu1 %vm2876_vm0, %v2875_v0 }
 0x486   : > { %2403 = vmatpush3.bf16.msra.mxu1 %v2551_v26 }
 0x487   : > { %2404 = vmatprep.subr.bf16.mxu1 %v2875_v0 }
 0x48a   : > { %2405 = vmatpush3.bf16.msra.mxu1 %v2552_v36 }
 0x531   : > { %v1604_v62 = vpop.f32.mrb[12].mxu1  ;;  %v1650_v63 = vpop.f32.mrb[16].mxu0 }
 0x532   : > { %v2382_v1 = vpop.f32.mrb[13].mxu1  ;;  %v2388_v2 = vpop.f32.mrb[17].mxu0 }
 0x533   : > { %v1607_v53 = vpop.f32.mrb[14].mxu1  ;;  %v1653_v3 = vpop.f32.mrb[18].mxu0 }
 0x534   : > { %v2383_v54 = vpop.f32.mrb[15].mxu1  ;;  %v2389_v4 = vpop.f32.mrb[19].mxu0 }
 0x557   : > { %v1696_v5 = vpop.f32.mrb[16].mxu1 }
 0x558   : > { %v1748_v7 = vcombine.low %v1604_v62, %v1696_v5  ;;  %v1749_v8 = vcombine.high %v1604_v62, %v1696_v5  ;;  %v1742_v9 = vpop.f32.mrb[20].mxu0  ;;  %v2394_v10 = vpop.f32.mrb[17].mxu1 }
 0x559   : > { %v1764_v11 = vcombine.low %v1650_v63, %v1742_v9  ;;  %v1765_v12 = vcombine.high %v1650_v63, %v1742_v9  ;;  %v2400_v13 = vpop.f32.mrb[21].mxu0  ;;  %v1699_v14 = vpop.f32.mrb[18].mxu1 }
 0x55a   : > { %v1756_v15 = vrot.slane %v1748_v7, %v3251_v35  ;;  %v1763_v16 = vrot.slane %v1749_v8, %v3251_v35  ;;  %v1745_v17 = vpop.f32.mrb[22].mxu0  ;;  %v2395_v18 = vpop.f32.mrb[19].mxu1 }
 0x55b   : > { %v1772_v19 = vrot.slane %v1764_v11, %v3251_v35  ;;  %v1779_v20 = vrot.slane %v1765_v12, %v3251_v35  ;;  %v2401_v21 = vpop.f32.mrb[23].mxu0 }
 0x55d   : > { %v1780_v22 = vcombine.low %v1756_v15, %v1772_v19  ;;  %v1781_v23 = vcombine.high %v1756_v15, %v1772_v19  ;;  %v1796_v24 = vcombine.low %v1763_v16, %v1779_v20  ;;  %v1797_v25 = vcombine.high %v1763_v16, %v1779_v20 }
 0x55f   : > { %v1788_v27 = vrot.slane %v1780_v22, %v3253_v42  ;;  %v1795_v28 = vrot.slane %v1781_v23, %v3253_v42  ;;  %v1804_v29 = vrot.slane %v1796_v24, %v3253_v42  ;;  %v1811_v30 = vrot.slane %v1797_v25, %v3253_v42 }
 0x561   : > { %v1816_v31 = vcombine.low %v1788_v27, %v1795_v28  ;;  %v2288_v32 = vcombine.high %v1788_v27, %v1795_v28  ;;  %v1832_v33 = vcombine.low %v1804_v29, %v1811_v30  ;;  %v2289_v34 = vcombine.high %v1804_v29, %v1811_v30 }
 0x563   : > { %v1823_v37 = vrot.slane %v1816_v31, %v3251_v35  ;;  %v1831_v38 = vrot.slane %v2288_v32, %v3251_v35  ;;  %v1839_v39 = vrot.slane %v1832_v33, %v3251_v35  ;;  %v1847_v40 = vrot.slane %v2289_v34, %v3251_v35 }
 0x565   : > { %v1849_v41 = vcombine.high %v1823_v37, %v1831_v38  ;;  %v1865_v43 = vcombine.high %v1839_v39, %v1847_v40  ;;  %v1848_v44 = vcombine.low %v1823_v37, %v1831_v38  ;;  %v1864_v45 = vcombine.low %v1839_v39, %v1847_v40 }
 0x567   : > { %v1863_v0 = vrot.slane %v1849_v41, %v3253_v42  ;;  %v1879_v46 = vrot.slane %v1865_v43, %v3253_v42  ;;  %v1856_v47 = vrot.slane %v1848_v44, %v3253_v42  ;;  %v1872_v48 = vrot.slane %v1864_v45, %v3253_v42 }
 0x569   : > { %v1882_v49 = vcombine.low %v1863_v0, %v1879_v46  ;;  %v1881_v50 = vcombine.high %v1856_v47, %v1872_v48  ;;  %v1883_v51 = vcombine.high %v1863_v0, %v1879_v46  ;;  %v1880_v52 = vcombine.low %v1856_v47, %v1872_v48 }
 0x56b   : > { %1889 = vrot.lane.b32.xlu1 %v1882_v49, %s2882_s20  ;;  %1885 = vrot.lane.b32.xlu0 %v1881_v50, %s2883_s28 }
 0x56f   : > { %1893 = vrot.lane.b32.xlu1 %v1883_v51, %s2884_s22 }
 0x5dd   : > { %v1890_v35 = vpop.permute.xlu1 %1889  ;;  %v1886_v55 = vpop.permute.xlu0 %1885 }
 0x5de   : > { %v1896_v56 = vsel %vm1326_vm2, %v1880_v52, %v1886_v55 }
 0x5df   : > { %v1898_v58 = vsel %vm1897_vm4, %v1896_v56, %v1890_v35 }
 0x5e1   : > { %v1894_v57 = vpop.permute.xlu1 %1893 }
 0x5e2   : > { %v1900_v42 = vsel %vm1899_vm5, %v1898_v58, %v1894_v57 }
 0x5e3   : > { %v1901_v59 = vpack.c.bf16 %v1900_v42, %v1900_v42 }
 0x5e5   : > { %2407 = vmatmul.mubr.msk.bf16.vlgmr.msra.gmra.mrb[20].mxu1 %vm698_vm1, %v1901_v59 }
 0x6b8   : > { %v1962_v61 = vpop.f32.mrb[20].mxu1 }
 0x6b9   : > { %v1963_v62 = vadd.f32 %v2290_v60, %v1962_v61  ;;  %v2408_v63 = vpop.f32.mrb[21].mxu1 }
 0x6ba   : > { %v1965_v1 = vpop.f32.mrb[22].mxu1 }
 0x6bb   : > { %v2409_v2 = vpop.f32.mrb[23].mxu1  ;;  %v1968_v53 = vadd.f32 %v1963_v62, %v3215_v6 }
 0x6bd   : > { %v1969_v3 = vsel %vm698_vm1, %v1968_v53, 0.0 }
 0x6be   : > { %1970 = vadd.xlane.f32.xlu0 %v1969_v3 }
 0x74b   : > { %v1971_v54 = vpop.xlane.xlu0 %1970 }
 0x74c   : > { %v1973_v4 = vmul.f32 0.03125, %v1971_v54 }
 0x74e   : > { %v1974_v5 = vsub.f32 %v1968_v53, %v1973_v4 }
 0x750   : > { %v1975_v7 = vmul.f32 %v1974_v5, %v1974_v5 }
 0x752   : > { %v1976_v8 = vsel %vm698_vm1, %v1975_v7, 0.0 }
 0x753   : > { %1977 = vadd.xlane.f32.xlu1 %v1976_v8 }
 0x754   : > { %2752 = shalt.err (!%p2749_p6)
}
 0x755   : > { %s2753_s19 = scalar_lea.hbm %s3406_s7, 512  ;;  %s2757_s15 = scalar_lea.hbm %s3552_s14, 1024 }
 0x756   : > { %p2754_p7 = scmp.ne.s32.totalorder %s3406_s7, %s2753_s19  ;;  %p2758_p0 = scmp.lt.u32.totalorder %s3406_s7, %s3552_s14 }
 0x757   : > { %p2759_p2 = scmp.lt.u32.totalorder %s2757_s15, %s2753_s19  ;;  %p2761_p1 = scmp.lt.u32.totalorder %s2753_s19, %s3406_s7 }
 0x758   : > { %p2755_p9 = pnand %p2754_p7, %p3553_p4 }
 0x759   : > { %p2760_p13 = por %p2759_p2, %p2758_p0 }
 0x75a   : > { %p2756_p12 = pneg %p2755_p9 }
 0x75b   : > { %p2762_p8 = por %p2761_p1, %p2760_p13 }
 0x75d   : > { %p2763_p10 = pnand %p2762_p8, %p2756_p12 }
 0x75f   : > { %2766 = shalt.err (!%p2763_p10)
}
 0x760   : > { %s2886_s23 = smov 128   ;;  %s2887_s26 = smov 256   ;;  %v2294_v12 = vld [vmem:[#allocation10] ss:$0 sm:$0xff]  ;;  %v2295_v14 = vld [vmem:[#allocation11] ss:$0 sm:$0xff] }
 0x761   : > { %2435 = dma.vmem_to_hbm [thread:$0]  (%p3553_p4), %s3409_s30, 512, %s3406_s7, %s2006_s3, %s2886_s23, %s2887_s26, %s2883_s28  }
 0x762   : > { %s2256_s18 = sshll.u32 %s3329_s16, 3  ;;  %s3554_s17 = sld [smem:[#allocation35_spill]] }
 0x763   : > { %s638_s11 = scalar_lea.vmem [#allocation13], %s2256_s18  ;;  %s2001_s7 = scalar_lea.sflag [#allocation4], %s3329_s16 }
 0x764   : > { %s2020_s9 = sshll.u32 %s638_s11, 4  ;;  %s2888_s3 = smov [#allocation13]   ;;  %s3444_s9 = int_to_ptr.vmem [resolvable:$true] %s2020_s9 }
 0x765   : > { %s2767_s30 = scalar_lea.vmem %s3444_s9, 128  ;;  %s2771_s21 = sshll.u32 %s2888_s3, 4  ;;  %s2772_s21 = int_to_ptr.vmem [resolvable:$false] %s2771_s21 }
 0x766   : > { %p2768_p11 = scmp.ne.s32.totalorder %s3444_s9, %s2767_s30  ;;  %s2773_s29 = scalar_lea.vmem %s2772_s21, 256 }
 0x767   : > { %p2774_p6 = scmp.lt.s32.totalorder %s3444_s9, %s2772_s21  ;;  %p2775_p7 = scmp.lt.s32.totalorder %s2773_s29, %s2767_s30 }
 0x768   : > { %s3442_s28 = scalar_lea.hbm %s3554_s17, %s2298_s25  ;;  %p2769_p3 = pnand %p2768_p11, %p3553_p4 }
 0x769   : > { %p2776_p9 = por %p2775_p7, %p2774_p6 }
 0x76a   : > { %p2770_p5 = pneg %p2769_p3 }
 0x76c   : > { %p2777_p12 = pnand %p2776_p9, %p2770_p5 }
 0x7e0   : > { %v1978_v6 = vpop.xlane.xlu1 %1977 }
 0x7e1   : > { %v1979_v9 = vmul.f32 0.03125, %v1978_v6 }
 0x7e3   : > { %v1980_v10 = vadd.f32 1e-05, %v1979_v9 }
 0x7e5   : > { %2569 = vrsqrt.f32 %v1980_v10 }
 0x7ef   : > { %v2570_v11 = vpop.eup %2569 }
 0x7f0   : > { %v1982_v13 = vmul.f32 %v2570_v11, %v1974_v5 }
 0x7f2   : > { %v1990_v15 = vmul.f32 %v2294_v12, %v1982_v13 }
 0x7f4   : > { %v1998_v16 = vadd.f32 %v2295_v14, %v1990_v15 }
 0x7f6   : > { %1999 = vst.msk [vmem:[%s638_s11] sm:$0xff] %vm698_vm1, %v1998_v16 }
 0x7f7   : > { %2780 = shalt.err (!%p2777_p12)
}
 0x7f8   : > { %s2781_s16 = scalar_lea.hbm %s3442_s28, 128  ;;  %s2785_s20 = scalar_lea.hbm %s3554_s17, 256 }
 0x7f9   : > { %p2782_p0 = scmp.ne.s32.totalorder %s3442_s28, %s2781_s16  ;;  %p2786_p1 = scmp.lt.u32.totalorder %s3442_s28, %s3554_s17 }
 0x7fa   : > { %p2787_p8 = scmp.lt.u32.totalorder %s2785_s20, %s2781_s16  ;;  %p2789_p11 = scmp.lt.u32.totalorder %s2781_s16, %s3442_s28 }
 0x7fb   : > { %p2783_p2 = pnand %p2782_p0, %p3553_p4 }
 0x7fc   : > { %p2788_p10 = por %p2787_p8, %p2786_p1 }
 0x7fd   : > { %p2784_p13 = pneg %p2783_p2 }
 0x7fe   : > { %p2790_p3 = por %p2789_p11, %p2788_p10 }
 0x800   : > { %p2791_p5 = pnand %p2790_p3, %p2784_p13 }
 0x802   : > { %2794 = shalt.err (!%p2791_p5)
}
 0x803   : > { %2434 = dma.vmem_to_hbm [thread:$0]  (%p3553_p4), %s3444_s9, 128, %s3442_s28, %s2001_s7  }
 0x804 PF: > { %s3555_s26 = sld [smem:[#allocation26_spill]]  ;;  %s3556_s18 = sld [smem:[#allocation22_spill]] }
 0x805   : > { %s3557_s11 = sld [smem:[#allocation29_spill]] }
 0x80a   : > { %p2476_p6 = scmp.ge.s32.totalorder %s3555_s26, 2  ;;  %s2048_s24 = sand.u32 1, %s3556_s18  }
 0x80b   : > { %p3558_p7 = scmp.ne.s32.totalorder %s3557_s11, 0  ;;  %s2049_s19 = scalar_lea.sflag [#allocation4], %s2048_s24 }
 0x80d   : > { %p2458_p9 = pnand %p2476_p6, %p3558_p7 }
 0x80f   : > { %2836 = dma.done.wait (!%p2458_p9), %s2049_s19, 128  }
 0x810   : > { %2838 = vsyncadd (!%p2458_p9), %s2049_s19, 4294967168  ;;  %s2058_s30 = scalar_lea.sflag [#allocation15], %s2048_s24 }
 0x811   : > { %2840 = dma.done.wait (!%p2458_p9), %s2058_s30, 512  }
 0x812   : > { %2842 = vsyncadd (!%p2458_p9), %s2058_s30, 4294966784  ;;  %s36_s23 = sadd.s32 1, %s3555_s26   ;;  %s3559_s18 = sld [smem:[#allocation23_spill]] }
 0x813   : > { %p33_p12 = scmp.ge.s32.totalorder %s36_s23, 4   ;;  %s3560_s19 = sld [smem:[#allocation24_spill]] }
 0x814   : > { %s3561_s20 = sld [smem:[#allocation30_spill]]  ;;  %s3562_s21 = sld [smem:[#allocation25_spill]] }
 0x815   : > { %s3563_s22 = sld [smem:[#allocation27_spill]]  ;;  %35 = sbr.rel (!%p33_p12) target bundleno = 17 (0x11), region = 162 }
 0x81c   :  { %2063 = vsyncpa [#allocation3], 1 }
 0x81d   :  { %2065 = vsyncpa [#allocation3 + $0x1], 1 }
 0x81e   :  { %2066 = vsyncpa [#allocation6], 1 }
 0x81f   :  { %2067 = vsyncpa [#allocation9], 1 }
 0x820   :  { %2068 = vsyncpa [#allocation12], 1 }
 0x821   :  { %2069 = vsyncpa [#allocation4], 1 }
 0x822   :  { %2071 = vsyncpa [#allocation4 + $0x1], 1 }
 0x823   :  { %2072 = vsyncpa [#allocation15], 1 }
 0x824   :  { %2074 = vsyncpa [#allocation15 + $0x1], 1 }

</bundles_post_ra>
